<compile_context>
chip_gen: v7x
topology: tpu7x:2x2x1
jax: 0.10.0
libtpu: 0.0.40
codegen_flags: <defaults>
</compile_context>

<pallas_src>
import functools
import math

import jax
import jax.numpy as jnp
from jax.experimental import pallas as pl
from jax.experimental.pallas import tpu as pltpu


# ------------------------------ helpers -------------------------------------

def _full_spec(shape):
    n = len(shape)
    return pl.BlockSpec(shape, lambda i: (0,) * n)


def _layernorm_padded(x, gamma, beta, real_h, padded_h):
    """LayerNorm over the REAL hidden columns of a zero-padded (M, HP) block.

    Padded columns of `x` are zero and `gamma`/`beta` are zero there, so the
    padded columns of the output stay exactly zero.  Two-pass variance with an
    exact correction for the zero padding columns.
    """
    inv_h = 1.0 / real_h
    pad = float(padded_h - real_h)
    mean = jnp.sum(x, axis=-1, keepdims=True) * inv_h
    d = x - mean
    var = (jnp.sum(d * d, axis=-1, keepdims=True) - pad * mean * mean) * inv_h
    var = jnp.maximum(var, 0.0)
    return d * jax.lax.rsqrt(var + 1e-12) * gamma + beta


def _gelu(x):
    # TODO(synk): tanh-approx GELU; transformers' BERT GELU is erf-based
    # (tiny numerical difference).
    c = math.sqrt(2.0 / math.pi)
    return 0.5 * x * (1.0 + jnp.tanh(c * (x + 0.044715 * x * x * x)))


# ----------------------- fused transformer stack -----------------------------

def _bert_layers_kernel(x_ref, bias_ref, eg_ref, eb_ref, wqkv_ref, bqkv_ref,
                        wo_ref, bo_ref, ln1g_ref, ln1b_ref, wi_ref, bi_ref,
                        wo2_ref, bo2_ref, ln2g_ref, ln2b_ref, o_ref, ctx_ref,
                        *, nh, dhp, real_h, hp):
    l = pl.program_id(1)

    # Layer 0: fused embedding LayerNorm seeds the resident activation
    # (output block stays in VMEM across the whole layer axis).
    @pl.when(l == 0)
    def _():
        emb = x_ref[...].astype(jnp.float32)
        o_ref[...] = _layernorm_padded(emb, eg_ref[...], eb_ref[...],
                                       real_h, hp).astype(o_ref.dtype)

    x = o_ref[...]                                         # (S, HP) bf16
    bias = bias_ref[...]                                   # (1, S)  f32

    # Fused QKV projection, kept bf16 (MXU-native, half the VMEM footprint).
    qkv = (jnp.dot(x, wqkv_ref[...], preferred_element_type=jnp.float32)
           + bqkv_ref[...]).astype(jnp.bfloat16)           # (S, 3*HP)

    # Per-head attention.  The 1/sqrt(dh) scale is folded into wq/bq at init;
    # heads occupy padded dhp-wide column blocks (zero in the pad columns), so
    # per-head contexts land directly in their slice of the ctx scratch and
    # the padded context columns come out exactly zero.
    # TODO(synk): at real head counts (12 @ BERT-base) replace this static
    # unroll with a head-batched einsum over a (nh, S, dhp)-major layout.
    for h in range(nh):
        c = h * dhp
        q = qkv[:, c:c + dhp]                              # bf16, pre-scaled
        k = qkv[:, hp + c:hp + c + dhp]
        v = qkv[:, 2 * hp + c:2 * hp + c + dhp]
        # q @ k^T on the MXU with bf16 operands, f32 accumulation.
        s = jax.lax.dot_general(q, k, (((1,), (1,)), ((), ())),
                                preferred_element_type=jnp.float32)   # (S, S)
        s = s + bias
        m = jnp.max(s, axis=-1, keepdims=True)
        e = jnp.exp(s - m)
        p = e * pl.reciprocal(jnp.sum(e, axis=-1, keepdims=True), approx=True)
        ctx_ref[:, c:c + dhp] = jnp.dot(p.astype(jnp.bfloat16), v,
                                        preferred_element_type=jnp.float32)

    attn = (jnp.dot(ctx_ref[...].astype(jnp.bfloat16), wo_ref[...],
                    preferred_element_type=jnp.float32) + bo_ref[...])
    x1 = _layernorm_padded(attn + x.astype(jnp.float32),
                           ln1g_ref[...], ln1b_ref[...], real_h, hp)

    ffn = jnp.dot(x1.astype(jnp.bfloat16), wi_ref[...],
                  preferred_element_type=jnp.float32) + bi_ref[...]
    ffn = _gelu(ffn)
    out = (jnp.dot(ffn.astype(jnp.bfloat16), wo2_ref[...],
                   preferred_element_type=jnp.float32) + bo2_ref[...])
    x2 = _layernorm_padded(out + x1, ln2g_ref[...], ln2b_ref[...], real_h, hp)

    o_ref[...] = x2.astype(o_ref.dtype)


def pallas_bert_layers(emb, bias, emb_ln_g, emb_ln_b, st, *, B, S, nh,
                       real_h, hp, inter):
    """emb: (B, S, HP) bf16 embedding sum; returns (B, S, HP) bf16."""
    L = st["wqkv"].shape[0]
    dhp = hp // nh

    kernel = functools.partial(_bert_layers_kernel, nh=nh, dhp=dhp,
                               real_h=real_h, hp=hp)

    def act_spec():
        return pl.BlockSpec((None, S, hp), lambda b, l: (b, 0, 0))

    def layer_spec(shape):
        n = len(shape)
        return pl.BlockSpec((None,) + shape[1:],
                            lambda b, l: (l,) + (0,) * (n - 1))

    mxu_flops = (2 * S * hp * 3 * hp                 # fused QKV
                 + nh * (2 * S * S * dhp) * 2        # q.k^T + p.v
                 + 2 * S * hp * hp                   # output projection
                 + 2 * S * hp * inter + 2 * S * inter * hp)   # FFN
    weight_bytes = sum(int(v.size) * v.dtype.itemsize for v in st.values())
    cost = pl.CostEstimate(
        flops=int(B * L * mxu_flops),
        transcendentals=int(B * L * (nh * S * S + S * inter)),
        bytes_accessed=int(B * weight_bytes + 2 * B * S * hp * 2 + B * S * 4),
    )

    # NOTE: with batch as the outer (parallel) axis the stacked weights are
    # re-fetched once per batch block; at real sizes each TensorCore owns a
    # batch shard so this is the intended weight-streaming pattern.
    return pl.pallas_call(
        kernel,
        grid=(B, L),
        in_specs=[
            act_spec(),                                           # emb
            pl.BlockSpec((None, 1, S), lambda b, l: (b, 0, 0)),   # mask bias
            pl.BlockSpec((1, hp), lambda b, l: (0, 0)),           # emb LN gamma
            pl.BlockSpec((1, hp), lambda b, l: (0, 0)),           # emb LN beta
            layer_spec((L, hp, 3 * hp)),                          # wqkv
            layer_spec((L, 1, 3 * hp)),                           # bqkv
            layer_spec((L, hp, hp)),                              # wo
            layer_spec((L, 1, hp)),                               # bo
            layer_spec((L, 1, hp)),                               # ln1 gamma
            layer_spec((L, 1, hp)),                               # ln1 beta
            layer_spec((L, hp, inter)),                           # wi
            layer_spec((L, 1, inter)),                            # bi
            layer_spec((L, inter, hp)),                           # wo2
            layer_spec((L, 1, hp)),                               # bo2
            layer_spec((L, 1, hp)),                               # ln2 gamma
            layer_spec((L, 1, hp)),                               # ln2 beta
        ],
        out_specs=act_spec(),
        out_shape=jax.ShapeDtypeStruct((B, S, hp), jnp.bfloat16),
        scratch_shapes=[pltpu.VMEM((S, hp), jnp.float32)],        # head context
        compiler_params=pltpu.CompilerParams(
            dimension_semantics=("parallel", "arbitrary"),
            vmem_limit_bytes=48 * 1024 * 1024),
        cost_estimate=cost,
    )(emb, bias, emb_ln_g, emb_ln_b,
      st["wqkv"], st["bqkv"], st["wo"], st["bo"], st["ln1_g"], st["ln1_b"],
      st["wi"], st["bi"], st["wo2"], st["bo2"], st["ln2_g"], st["ln2_b"])


# ------------------------------ fused heads ----------------------------------

def _head_train_kernel(cls_ref, pw_ref, pb_ref, cw_ref, cb_ref, lab_ref,
                       lm_ref, o_ref):
    pooled = jnp.tanh(jnp.dot(cls_ref[...], pw_ref[...],
                              preferred_element_type=jnp.float32) + pb_ref[...])
    # TODO(synk): nn.Dropout on pooled_output is identity (deterministic fwd).
    logits = jnp.dot(pooled, cw_ref[...],
                     preferred_element_type=jnp.float32) + cb_ref[...]   # (B, 3)
    m = jnp.max(logits, axis=-1, keepdims=True)
    lse = jnp.log(jnp.sum(jnp.exp(logits - m), axis=-1, keepdims=True)) + m
    logp = logits - lse
    labels = lab_ref[...]                                                # (B, 1)
    onehot = jax.lax.broadcasted_iota(jnp.int32, logp.shape, 1) == labels
    nll = -jnp.sum(jnp.where(onehot, logp, 0.0), axis=-1, keepdims=True)
    mask = lm_ref[...]                                                   # (B, 1)
    # NOTE: matches reference semantics (divides by sum(label_masks), no guard).
    o_ref[...] = (jnp.sum(nll * mask, axis=(0, 1), keepdims=True)
                  / jnp.sum(mask, axis=(0, 1), keepdims=True))


def pallas_head_train(cls, pooler_w, pooler_b, cls_w, cls_b, labels,
                      label_masks):
    B, HP = cls.shape
    N = cls_w.shape[1]
    return pl.pallas_call(
        _head_train_kernel,
        grid=(1,),
        in_specs=[
            _full_spec((B, HP)),
            _full_spec((HP, HP)), _full_spec((1, HP)),
            _full_spec((HP, N)), _full_spec((1, N)),
            _full_spec((B, 1)), _full_spec((B, 1)),
        ],
        out_specs=_full_spec((1, 1)),
        out_shape=jax.ShapeDtypeStruct((1, 1), jnp.float32),
    )(cls, pooler_w, pooler_b, cls_w, cls_b,
      labels.reshape(B, 1).astype(jnp.int32),
      label_masks.reshape(B, 1).astype(jnp.float32))


def _head_infer_kernel(cls_ref, pw_ref, pb_ref, dw_ref, db_ref, cw_ref, cb_ref,
                       o_ref):
    pooled = jnp.tanh(jnp.dot(cls_ref[...], pw_ref[...],
                              preferred_element_type=jnp.float32) + pb_ref[...])
    hidden = jnp.dot(pooled.astype(jnp.bfloat16), dw_ref[...],
                     preferred_element_type=jnp.float32) + db_ref[...]
    # TODO(synk): nn.Dropout between dense and classifier is identity here.
    o_ref[...] = jnp.dot(hidden, cw_ref[...],
                         preferred_element_type=jnp.float32) + cb_ref[...]


def pallas_head_infer(cls, pooler_w, pooler_b, dense_w, dense_b, cls_w, cls_b):
    B, HP = cls.shape
    N = cls_w.shape[1]
    return pl.pallas_call(
        _head_infer_kernel,
        grid=(1,),
        in_specs=[
            _full_spec((B, HP)),
            _full_spec((HP, HP)), _full_spec((1, HP)),
            _full_spec((HP, HP)), _full_spec((1, HP)),
            _full_spec((HP, N)), _full_spec((1, N)),
        ],
        out_specs=_full_spec((B, N)),
        out_shape=jax.ShapeDtypeStruct((B, N), jnp.float32),
    )(cls, pooler_w, pooler_b, dense_w, dense_b, cls_w, cls_b)


# ------------------------ parameters & model glue ----------------------------

def init_params(key, cfg):
    std = cfg["initializer_range"]
    H = cfg["hidden_size"]
    HP = cfg["hidden_size_padded"]
    inter = cfg["intermediate_size"]
    L = cfg["num_hidden_layers"]
    nh = cfg["num_attention_heads"]
    dh = H // nh
    dhp = HP // nh
    scale = 1.0 / math.sqrt(dh)
    keys = iter(jax.random.split(key, 1024))

    def normal(shape):
        return (std * jax.random.normal(next(keys), shape)).astype(jnp.float32)

    def pad2(w, rows, cols):
        out = jnp.zeros((rows, cols), jnp.float32)
        return out.at[:w.shape[0], :w.shape[1]].set(w)

    def head_cols(w):
        # (rows, nh*dh) -> (rows, nh*dhp): head h's real cols at h*dhp.
        out = jnp.zeros((w.shape[0], nh * dhp), jnp.float32)
        for h in range(nh):
            out = out.at[:, h * dhp:h * dhp + dh].set(w[:, h * dh:(h + 1) * dh])
        return out

    def head_rows(w):
        # (nh*dh, cols) -> (nh*dhp, cols): head h's real rows at h*dhp.
        out = jnp.zeros((nh * dhp, w.shape[1]), jnp.float32)
        for h in range(nh):
            out = out.at[h * dhp:h * dhp + dh, :].set(w[h * dh:(h + 1) * dh, :])
        return out

    def gamma_pad():
        return jnp.concatenate([jnp.ones((1, H), jnp.float32),
                                jnp.zeros((1, HP - H), jnp.float32)], axis=1)

    params = {
        "word_emb": pad2(normal((cfg["vocab_size"], H)),
                         cfg["vocab_size"], HP).astype(jnp.bfloat16),
        "pos_emb": pad2(normal((cfg["max_position_embeddings"], H)),
                        cfg["max_position_embeddings"], HP).astype(jnp.bfloat16),
        "type_emb": pad2(normal((cfg["type_vocab_size"], H)),
                         cfg["type_vocab_size"], HP).astype(jnp.bfloat16),
        "emb_ln_g": gamma_pad(),
        "emb_ln_b": jnp.zeros((1, HP), jnp.float32),
        "pooler_w": pad2(normal((H, H)), HP, HP).astype(jnp.bfloat16),
        "pooler_b": jnp.zeros((1, HP), jnp.float32),
        "dense_w": pad2(normal((H, H)), HP, HP).astype(jnp.bfloat16),
        "dense_b": jnp.zeros((1, HP), jnp.float32),
        "cls_w": pad2(normal((H, 3)), HP, 3),
        "cls_b": jnp.zeros((1, 3), jnp.float32),
    }

    layers = []
    for _ in range(L):
        # Padded per-head column layout; 1/sqrt(dh) folded into the Q proj.
        wq_p = pad2(head_cols(normal((H, H))) * scale, HP, HP)
        wk_p = pad2(head_cols(normal((H, H))), HP, HP)
        wv_p = pad2(head_cols(normal((H, H))), HP, HP)
        layers.append({
            "wqkv": jnp.concatenate([wq_p, wk_p, wv_p], axis=1).astype(jnp.bfloat16),
            "bqkv": jnp.zeros((1, 3 * HP), jnp.float32),
            "wo": pad2(head_rows(normal((H, H))), HP, HP).astype(jnp.bfloat16),
            "bo": jnp.zeros((1, HP), jnp.float32),
            "ln1_g": gamma_pad(), "ln1_b": jnp.zeros((1, HP), jnp.float32),
            "wi": pad2(normal((H, inter)), HP, inter).astype(jnp.bfloat16),
            "bi": jnp.zeros((1, inter), jnp.float32),
            "wo2": pad2(normal((inter, H)), inter, HP).astype(jnp.bfloat16),
            "bo2": jnp.zeros((1, HP), jnp.float32),
            "ln2_g": gamma_pad(), "ln2_b": jnp.zeros((1, HP), jnp.float32),
        })
    # Stack each per-layer weight along a leading layer axis for the layer grid.
    params["stack"] = {k: jnp.stack([lp[k] for lp in layers], axis=0)
                       for k in layers[0]}
    return params


def bert_forward(params, cfg, input_ids, token_type_ids, attention_mask):
    B, S = input_ids.shape
    H = cfg["hidden_size"]
    HP = cfg["hidden_size_padded"]
    nh = cfg["num_attention_heads"]
    inter = cfg["intermediate_size"]

    pos = jnp.arange(S)
    emb = (params["word_emb"][input_ids]
           + params["pos_emb"][pos][None, :, :]
           + params["type_emb"][token_type_ids])            # (B, S, HP) bf16

    bias = ((1.0 - attention_mask.astype(jnp.float32)) * -10000.0
            ).reshape(B, 1, S)                              # (B, 1, S) f32

    x = pallas_bert_layers(emb, bias, params["emb_ln_g"], params["emb_ln_b"],
                           params["stack"], B=B, S=S, nh=nh,
                           real_h=H, hp=HP, inter=inter)    # (B, S, HP) bf16
    return x


def span_aspect_classification_forward(params, cfg, mode, attention_mask,
                                       input_ids=None, token_type_ids=None,
                                       labels=None, label_masks=None):
    if mode == "train":
        assert labels is not None
        x = bert_forward(params, cfg, input_ids, token_type_ids, attention_mask)
        cls = x[:, 0, :]                                    # only [CLS] rows
        loss = pallas_head_train(cls, params["pooler_w"], params["pooler_b"],
                                 params["cls_w"], params["cls_b"],
                                 labels, label_masks)
        return loss[0, 0]
    elif mode == "inference":
        # original code calls self.bert without attention_mask -> all-ones mask
        ones_mask = jnp.ones_like(input_ids)
        x = bert_forward(params, cfg, input_ids, token_type_ids, ones_mask)
        cls = x[:, 0, :]
        return pallas_head_infer(cls, params["pooler_w"], params["pooler_b"],
                                 params["dense_w"], params["dense_b"],
                                 params["cls_w"], params["cls_b"])
    else:
        raise Exception


# ---------------------------------- main -------------------------------------

if __name__ == "__main__":
    cfg = dict(
        vocab_size=128,
        hidden_size=64,            # real hidden size
        hidden_size_padded=128,    # lane-dense padded hidden size
        num_hidden_layers=2,
        num_attention_heads=2,
        intermediate_size=128,
        max_position_embeddings=32,
        type_vocab_size=2,
        initializer_range=0.02,
        hidden_dropout_prob=0.1,
    )
    B, S = 2, 8

    root = jax.random.PRNGKey(0)
    kp, kid, klab = jax.random.split(root, 3)
    params = init_params(kp, cfg)

    input_ids = jax.random.randint(kid, (B, S), 0, cfg["vocab_size"], jnp.int32)
    token_type_ids = jnp.zeros((B, S), jnp.int32)
    attention_mask = jnp.ones((B, S), jnp.int32).at[1, S - 2:].set(0)
    labels = jax.random.randint(klab, (B,), 0, 3, jnp.int32)
    label_masks = jnp.ones((B,), jnp.float32)

    mean_loss = span_aspect_classification_forward(
        params, cfg, "train", attention_mask,
        input_ids=input_ids, token_type_ids=token_type_ids,
        labels=labels, label_masks=label_masks)
    mean_loss = jax.block_until_ready(mean_loss)

    cls_logits = span_aspect_classification_forward(
        params, cfg, "inference", attention_mask,
        input_ids=input_ids, token_type_ids=token_type_ids)
    cls_logits = jax.block_until_ready(cls_logits)

    assert mean_loss.shape == () and cls_logits.shape == (B, 3)
    assert bool(jnp.isfinite(mean_loss)) and bool(jnp.all(jnp.isfinite(cls_logits)))
    print("KERNEL_OK")
</pallas_src>

<mosaic_0001>
module attributes {stable_mosaic.version = 11 : i64} {
  func.func @_bert_layers_kernel(%arg0: i32, %arg1: i32, %arg2: memref<1x8x128xbf16, #tpu.memory_space<vmem>>, %arg3: memref<1x1x8xf32, #tpu.memory_space<vmem>>, %arg4: memref<1x128xf32, #tpu.memory_space<vmem>>, %arg5: memref<1x128xf32, #tpu.memory_space<vmem>>, %arg6: memref<1x128x384xbf16, #tpu.memory_space<vmem>>, %arg7: memref<1x1x384xf32, #tpu.memory_space<vmem>>, %arg8: memref<1x128x128xbf16, #tpu.memory_space<vmem>>, %arg9: memref<1x1x128xf32, #tpu.memory_space<vmem>>, %arg10: memref<1x1x128xf32, #tpu.memory_space<vmem>>, %arg11: memref<1x1x128xf32, #tpu.memory_space<vmem>>, %arg12: memref<1x128x128xbf16, #tpu.memory_space<vmem>>, %arg13: memref<1x1x128xf32, #tpu.memory_space<vmem>>, %arg14: memref<1x128x128xbf16, #tpu.memory_space<vmem>>, %arg15: memref<1x1x128xf32, #tpu.memory_space<vmem>>, %arg16: memref<1x1x128xf32, #tpu.memory_space<vmem>>, %arg17: memref<1x1x128xf32, #tpu.memory_space<vmem>>, %arg18: memref<1x8x128xbf16, #tpu.memory_space<vmem>>, %arg19: memref<8x128xf32, #tpu.memory_space<vmem>>) attributes {dimension_semantics = [#tpu.dimension_semantics<parallel>, #tpu.dimension_semantics<arbitrary>], iteration_bounds = array<i64: 2, 2>, scalar_prefetch = 0 : i64, scratch_operands = 1 : i64, tpu.core_type = #tpu.core_type<tc>, window_params = [{transform_indices = @transform_0, window_bounds = array<i64: 1, 8, 128>}, {transform_indices = @transform_1, window_bounds = array<i64: 1, 1, 8>}, {pipeline_mode = #tpu.pipeline_mode<synchronous>, transform_indices = @transform_2, window_bounds = array<i64: 1, 128>}, {pipeline_mode = #tpu.pipeline_mode<synchronous>, transform_indices = @transform_3, window_bounds = array<i64: 1, 128>}, {transform_indices = @transform_4, window_bounds = array<i64: 1, 128, 384>}, {transform_indices = @transform_5, window_bounds = array<i64: 1, 1, 384>}, {transform_indices = @transform_6, window_bounds = array<i64: 1, 128, 128>}, {transform_indices = @transform_7, window_bounds = array<i64: 1, 1, 128>}, {transform_indices = @transform_8, window_bounds = array<i64: 1, 1, 128>}, {transform_indices = @transform_9, window_bounds = array<i64: 1, 1, 128>}, {transform_indices = @transform_10, window_bounds = array<i64: 1, 128, 128>}, {transform_indices = @transform_11, window_bounds = array<i64: 1, 1, 128>}, {transform_indices = @transform_12, window_bounds = array<i64: 1, 128, 128>}, {transform_indices = @transform_13, window_bounds = array<i64: 1, 1, 128>}, {transform_indices = @transform_14, window_bounds = array<i64: 1, 1, 128>}, {transform_indices = @transform_15, window_bounds = array<i64: 1, 1, 128>}, {transform_indices = @transform_16, window_bounds = array<i64: 1, 8, 128>}]} {
    %c0_i32 = arith.constant 0 : i32
    %0 = arith.cmpi eq, %arg1, %c0_i32 : i32
    %1 = arith.extui %0 : i1 to i32
    %c0_i32_0 = arith.constant 0 : i32
    %2 = arith.cmpi ne, %1, %c0_i32_0 : i32
    scf.if %2 {
      %c0_79 = arith.constant 0 : index
      %c0_80 = arith.constant 0 : index
      %c0_81 = arith.constant 0 : index
      %158 = vector.load %arg2[%c0_79, %c0_80, %c0_81] : memref<1x8x128xbf16, #tpu.memory_space<vmem>>, vector<1x8x128xbf16>
      %159 = vector.shape_cast %158 : vector<1x8x128xbf16> to vector<8x128xbf16>
      %160 = arith.extf %159 : vector<8x128xbf16> to vector<8x128xf32>
      %c0_82 = arith.constant 0 : index
      %c0_83 = arith.constant 0 : index
      %161 = vector.load %arg4[%c0_82, %c0_83] : memref<1x128xf32, #tpu.memory_space<vmem>>, vector<1x128xf32>
      %c0_84 = arith.constant 0 : index
      %c0_85 = arith.constant 0 : index
      %162 = vector.load %arg5[%c0_84, %c0_85] : memref<1x128xf32, #tpu.memory_space<vmem>>, vector<1x128xf32>
      %cst_86 = arith.constant dense<0.000000e+00> : vector<8xf32>
      %163 = vector.multi_reduction <add>, %160, %cst_86 [1] : vector<8x128xf32> to vector<8xf32>
      %164 = vector.shape_cast %163 : vector<8xf32> to vector<8x1xf32>
      %cst_87 = arith.constant 1.562500e-02 : f32
      %165 = vector.broadcast %cst_87 : f32 to vector<8x1xf32>
      %166 = arith.mulf %164, %165 : vector<8x1xf32>
      %167 = vector.broadcast %166 : vector<8x1xf32> to vector<8x128xf32>
      %168 = arith.subf %160, %167 : vector<8x128xf32>
      %169 = arith.mulf %168, %168 : vector<8x128xf32>
      %cst_88 = arith.constant dense<0.000000e+00> : vector<8xf32>
      %170 = vector.multi_reduction <add>, %169, %cst_88 [1] : vector<8x128xf32> to vector<8xf32>
      %171 = vector.shape_cast %170 : vector<8xf32> to vector<8x1xf32>
      %cst_89 = arith.constant 6.400000e+01 : f32
      %172 = vector.broadcast %cst_89 : f32 to vector<8x1xf32>
      %173 = arith.mulf %172, %166 : vector<8x1xf32>
      %174 = arith.mulf %173, %166 : vector<8x1xf32>
      %175 = arith.subf %171, %174 : vector<8x1xf32>
      %cst_90 = arith.constant 1.562500e-02 : f32
      %176 = vector.broadcast %cst_90 : f32 to vector<8x1xf32>
      %177 = arith.mulf %175, %176 : vector<8x1xf32>
      %cst_91 = arith.constant 0.000000e+00 : f32
      %178 = vector.broadcast %cst_91 : f32 to vector<8x1xf32>
      %179 = arith.maximumf %177, %178 : vector<8x1xf32>
      %cst_92 = arith.constant 9.99999996E-13 : f32
      %180 = vector.broadcast %cst_92 : f32 to vector<8x1xf32>
      %181 = arith.addf %179, %180 : vector<8x1xf32>
      %182 = math.rsqrt %181 : vector<8x1xf32>
      %183 = vector.broadcast %182 : vector<8x1xf32> to vector<8x128xf32>
      %184 = arith.mulf %168, %183 : vector<8x128xf32>
      %185 = vector.broadcast %161 : vector<1x128xf32> to vector<8x128xf32>
      %186 = arith.mulf %184, %185 : vector<8x128xf32>
      %187 = vector.broadcast %162 : vector<1x128xf32> to vector<8x128xf32>
      %188 = arith.addf %186, %187 : vector<8x128xf32>
      %189 = arith.truncf %188 : vector<8x128xf32> to vector<8x128xbf16>
      %c0_93 = arith.constant 0 : index
      %c0_94 = arith.constant 0 : index
      %c0_95 = arith.constant 0 : index
      %190 = vector.load %arg18[%c0_93, %c0_94, %c0_95] : memref<1x8x128xbf16, #tpu.memory_space<vmem>>, vector<1x8x128xbf16>
      %191 = vector.shape_cast %190 : vector<1x8x128xbf16> to vector<8x128xbf16>
      %192 = vector.shape_cast %189 : vector<8x128xbf16> to vector<1x8x128xbf16>
      tpu.vector_store %arg18[%c0_93, %c0_94, %c0_95], %192 {strides = array<i32>} : memref<1x8x128xbf16, #tpu.memory_space<vmem>>, vector<1x8x128xbf16>,
    } else {
    }
    %c0 = arith.constant 0 : index
    %c0_1 = arith.constant 0 : index
    %c0_2 = arith.constant 0 : index
    %3 = vector.load %arg18[%c0, %c0_1, %c0_2] : memref<1x8x128xbf16, #tpu.memory_space<vmem>>, vector<1x8x128xbf16>
    %4 = vector.shape_cast %3 : vector<1x8x128xbf16> to vector<8x128xbf16>
    %c0_3 = arith.constant 0 : index
    %c0_4 = arith.constant 0 : index
    %c0_5 = arith.constant 0 : index
    %5 = vector.load %arg3[%c0_3, %c0_4, %c0_5] : memref<1x1x8xf32, #tpu.memory_space<vmem>>, vector<1x1x8xf32>
    %6 = vector.shape_cast %5 : vector<1x1x8xf32> to vector<1x8xf32>
    %c0_6 = arith.constant 0 : index
    %c0_7 = arith.constant 0 : index
    %c0_8 = arith.constant 0 : index
    %7 = vector.load %arg6[%c0_6, %c0_7, %c0_8] : memref<1x128x384xbf16, #tpu.memory_space<vmem>>, vector<1x128x384xbf16>
    %8 = vector.shape_cast %7 : vector<1x128x384xbf16> to vector<128x384xbf16>
    %cst = arith.constant dense<0.000000e+00> : vector<8x384xf32>
    %9 = tpu.matmul %4, %8, %cst {dimension_numbers = #tpu.dot_dimension_numbers<[1], [0], [0], [1], [0, 0, 1, 1], [], []>} : vector<8x128xbf16>, vector<128x384xbf16>, vector<8x384xf32> -> vector<8x384xf32>
    %c0_9 = arith.constant 0 : index
    %c0_10 = arith.constant 0 : index
    %c0_11 = arith.constant 0 : index
    %10 = vector.load %arg7[%c0_9, %c0_10, %c0_11] : memref<1x1x384xf32, #tpu.memory_space<vmem>>, vector<1x1x384xf32>
    %11 = vector.shape_cast %10 : vector<1x1x384xf32> to vector<1x384xf32>
    %12 = vector.broadcast %11 : vector<1x384xf32> to vector<8x384xf32>
    %13 = arith.addf %9, %12 : vector<8x384xf32>
    %14 = arith.truncf %13 : vector<8x384xf32> to vector<8x384xbf16>
    %15 = vector.extract_strided_slice %14 {offsets = [0, 0], sizes = [8, 64], strides = [1, 1]} : vector<8x384xbf16> to vector<8x64xbf16>
    %16 = vector.extract_strided_slice %14 {offsets = [0, 128], sizes = [8, 64], strides = [1, 1]} : vector<8x384xbf16> to vector<8x64xbf16>
    %17 = vector.extract_strided_slice %14 {offsets = [0, 256], sizes = [8, 64], strides = [1, 1]} : vector<8x384xbf16> to vector<8x64xbf16>
    %cst_12 = arith.constant dense<0.000000e+00> : vector<8x8xf32>
    %18 = tpu.matmul %15, %16, %cst_12 {dimension_numbers = #tpu.dot_dimension_numbers<[1], [1], [0], [0], [0, 0, 1, 0], [], []>} : vector<8x64xbf16>, vector<8x64xbf16>, vector<8x8xf32> -> vector<8x8xf32>
    %19 = vector.broadcast %6 : vector<1x8xf32> to vector<8x8xf32>
    %20 = arith.addf %18, %19 : vector<8x8xf32>
    %cst_13 = arith.constant dense<0xFF800000> : vector<8xf32>
    %21 = vector.multi_reduction <maximumf>, %20, %cst_13 [1] : vector<8x8xf32> to vector<8xf32>
    %22 = vector.shape_cast %21 : vector<8xf32> to vector<8x1xf32>
    %23 = vector.broadcast %22 : vector<8x1xf32> to vector<8x8xf32>
    %24 = arith.subf %20, %23 : vector<8x8xf32>
    %25 = math.exp %24 : vector<8x8xf32>
    %cst_14 = arith.constant dense<0.000000e+00> : vector<8xf32>
    %26 = vector.multi_reduction <add>, %25, %cst_14 [1] : vector<8x8xf32> to vector<8xf32>
    %27 = vector.shape_cast %26 : vector<8xf32> to vector<8x1xf32>
    %28 = tpu.reciprocal %27 {approx = true} : vector<8x1xf32> -> vector<8x1xf32>
    %29 = vector.broadcast %28 : vector<8x1xf32> to vector<8x8xf32>
    %30 = arith.mulf %25, %29 : vector<8x8xf32>
    %31 = arith.truncf %30 : vector<8x8xf32> to vector<8x8xbf16>
    %cst_15 = arith.constant dense<0.000000e+00> : vector<8x64xf32>
    %32 = tpu.matmul %31, %17, %cst_15 {dimension_numbers = #tpu.dot_dimension_numbers<[1], [0], [0], [1], [0, 0, 1, 1], [], []>} : vector<8x8xbf16>, vector<8x64xbf16>, vector<8x64xf32> -> vector<8x64xf32>
    %c0_16 = arith.constant 0 : index
    %c0_17 = arith.constant 0 : index
    %33 = vector.load %arg19[%c0_16, %c0_17] : memref<8x128xf32, #tpu.memory_space<vmem>>, vector<8x64xf32>
    tpu.vector_store %arg19[%c0_16, %c0_17], %32 {strides = array<i32>} : memref<8x128xf32, #tpu.memory_space<vmem>>, vector<8x64xf32>,
    %34 = vector.extract_strided_slice %14 {offsets = [0, 64], sizes = [8, 64], strides = [1, 1]} : vector<8x384xbf16> to vector<8x64xbf16>
    %35 = vector.extract_strided_slice %14 {offsets = [0, 192], sizes = [8, 64], strides = [1, 1]} : vector<8x384xbf16> to vector<8x64xbf16>
    %36 = vector.extract_strided_slice %14 {offsets = [0, 320], sizes = [8, 64], strides = [1, 1]} : vector<8x384xbf16> to vector<8x64xbf16>
    %cst_18 = arith.constant dense<0.000000e+00> : vector<8x8xf32>
    %37 = tpu.matmul %34, %35, %cst_18 {dimension_numbers = #tpu.dot_dimension_numbers<[1], [1], [0], [0], [0, 0, 1, 0], [], []>} : vector<8x64xbf16>, vector<8x64xbf16>, vector<8x8xf32> -> vector<8x8xf32>
    %38 = vector.broadcast %6 : vector<1x8xf32> to vector<8x8xf32>
    %39 = arith.addf %37, %38 : vector<8x8xf32>
    %cst_19 = arith.constant dense<0xFF800000> : vector<8xf32>
    %40 = vector.multi_reduction <maximumf>, %39, %cst_19 [1] : vector<8x8xf32> to vector<8xf32>
    %41 = vector.shape_cast %40 : vector<8xf32> to vector<8x1xf32>
    %42 = vector.broadcast %41 : vector<8x1xf32> to vector<8x8xf32>
    %43 = arith.subf %39, %42 : vector<8x8xf32>
    %44 = math.exp %43 : vector<8x8xf32>
    %cst_20 = arith.constant dense<0.000000e+00> : vector<8xf32>
    %45 = vector.multi_reduction <add>, %44, %cst_20 [1] : vector<8x8xf32> to vector<8xf32>
    %46 = vector.shape_cast %45 : vector<8xf32> to vector<8x1xf32>
    %47 = tpu.reciprocal %46 {approx = true} : vector<8x1xf32> -> vector<8x1xf32>
    %48 = vector.broadcast %47 : vector<8x1xf32> to vector<8x8xf32>
    %49 = arith.mulf %44, %48 : vector<8x8xf32>
    %50 = arith.truncf %49 : vector<8x8xf32> to vector<8x8xbf16>
    %cst_21 = arith.constant dense<0.000000e+00> : vector<8x64xf32>
    %51 = tpu.matmul %50, %36, %cst_21 {dimension_numbers = #tpu.dot_dimension_numbers<[1], [0], [0], [1], [0, 0, 1, 1], [], []>} : vector<8x8xbf16>, vector<8x64xbf16>, vector<8x64xf32> -> vector<8x64xf32>
    %c0_22 = arith.constant 0 : index
    %c64 = arith.constant 64 : index
    %52 = vector.load %arg19[%c0_22, %c64] : memref<8x128xf32, #tpu.memory_space<vmem>>, vector<8x64xf32>
    tpu.vector_store %arg19[%c0_22, %c64], %51 {strides = array<i32>} : memref<8x128xf32, #tpu.memory_space<vmem>>, vector<8x64xf32>,
    %c0_23 = arith.constant 0 : index
    %c0_24 = arith.constant 0 : index
    %53 = vector.load %arg19[%c0_23, %c0_24] : memref<8x128xf32, #tpu.memory_space<vmem>>, vector<8x128xf32>
    %54 = arith.truncf %53 : vector<8x128xf32> to vector<8x128xbf16>
    %c0_25 = arith.constant 0 : index
    %c0_26 = arith.constant 0 : index
    %c0_27 = arith.constant 0 : index
    %55 = vector.load %arg8[%c0_25, %c0_26, %c0_27] : memref<1x128x128xbf16, #tpu.memory_space<vmem>>, vector<1x128x128xbf16>
    %56 = vector.shape_cast %55 : vector<1x128x128xbf16> to vector<128x128xbf16>
    %cst_28 = arith.constant dense<0.000000e+00> : vector<8x128xf32>
    %57 = tpu.matmul %54, %56, %cst_28 {dimension_numbers = #tpu.dot_dimension_numbers<[1], [0], [0], [1], [0, 0, 1, 1], [], []>} : vector<8x128xbf16>, vector<128x128xbf16>, vector<8x128xf32> -> vector<8x128xf32>
    %c0_29 = arith.constant 0 : index
    %c0_30 = arith.constant 0 : index
    %c0_31 = arith.constant 0 : index
    %58 = vector.load %arg9[%c0_29, %c0_30, %c0_31] : memref<1x1x128xf32, #tpu.memory_space<vmem>>, vector<1x1x128xf32>
    %59 = vector.shape_cast %58 : vector<1x1x128xf32> to vector<1x128xf32>
    %60 = vector.broadcast %59 : vector<1x128xf32> to vector<8x128xf32>
    %61 = arith.addf %57, %60 : vector<8x128xf32>
    %62 = arith.extf %4 : vector<8x128xbf16> to vector<8x128xf32>
    %63 = arith.addf %61, %62 : vector<8x128xf32>
    %c0_32 = arith.constant 0 : index
    %c0_33 = arith.constant 0 : index
    %c0_34 = arith.constant 0 : index
    %64 = vector.load %arg10[%c0_32, %c0_33, %c0_34] : memref<1x1x128xf32, #tpu.memory_space<vmem>>, vector<1x1x128xf32>
    %65 = vector.shape_cast %64 : vector<1x1x128xf32> to vector<1x128xf32>
    %c0_35 = arith.constant 0 : index
    %c0_36 = arith.constant 0 : index
    %c0_37 = arith.constant 0 : index
    %66 = vector.load %arg11[%c0_35, %c0_36, %c0_37] : memref<1x1x128xf32, #tpu.memory_space<vmem>>, vector<1x1x128xf32>
    %67 = vector.shape_cast %66 : vector<1x1x128xf32> to vector<1x128xf32>
    %cst_38 = arith.constant dense<0.000000e+00> : vector<8xf32>
    %68 = vector.multi_reduction <add>, %63, %cst_38 [1] : vector<8x128xf32> to vector<8xf32>
    %69 = vector.shape_cast %68 : vector<8xf32> to vector<8x1xf32>
    %cst_39 = arith.constant 1.562500e-02 : f32
    %70 = vector.broadcast %cst_39 : f32 to vector<8x1xf32>
    %71 = arith.mulf %69, %70 : vector<8x1xf32>
    %72 = vector.broadcast %71 : vector<8x1xf32> to vector<8x128xf32>
    %73 = arith.subf %63, %72 : vector<8x128xf32>
    %74 = arith.mulf %73, %73 : vector<8x128xf32>
    %cst_40 = arith.constant dense<0.000000e+00> : vector<8xf32>
    %75 = vector.multi_reduction <add>, %74, %cst_40 [1] : vector<8x128xf32> to vector<8xf32>
    %76 = vector.shape_cast %75 : vector<8xf32> to vector<8x1xf32>
    %cst_41 = arith.constant 6.400000e+01 : f32
    %77 = vector.broadcast %cst_41 : f32 to vector<8x1xf32>
    %78 = arith.mulf %77, %71 : vector<8x1xf32>
    %79 = arith.mulf %78, %71 : vector<8x1xf32>
    %80 = arith.subf %76, %79 : vector<8x1xf32>
    %cst_42 = arith.constant 1.562500e-02 : f32
    %81 = vector.broadcast %cst_42 : f32 to vector<8x1xf32>
    %82 = arith.mulf %80, %81 : vector<8x1xf32>
    %cst_43 = arith.constant 0.000000e+00 : f32
    %83 = vector.broadcast %cst_43 : f32 to vector<8x1xf32>
    %84 = arith.maximumf %82, %83 : vector<8x1xf32>
    %cst_44 = arith.constant 9.99999996E-13 : f32
    %85 = vector.broadcast %cst_44 : f32 to vector<8x1xf32>
    %86 = arith.addf %84, %85 : vector<8x1xf32>
    %87 = math.rsqrt %86 : vector<8x1xf32>
    %88 = vector.broadcast %87 : vector<8x1xf32> to vector<8x128xf32>
    %89 = arith.mulf %73, %88 : vector<8x128xf32>
    %90 = vector.broadcast %65 : vector<1x128xf32> to vector<8x128xf32>
    %91 = arith.mulf %89, %90 : vector<8x128xf32>
    %92 = vector.broadcast %67 : vector<1x128xf32> to vector<8x128xf32>
    %93 = arith.addf %91, %92 : vector<8x128xf32>
    %94 = arith.truncf %93 : vector<8x128xf32> to vector<8x128xbf16>
    %c0_45 = arith.constant 0 : index
    %c0_46 = arith.constant 0 : index
    %c0_47 = arith.constant 0 : index
    %95 = vector.load %arg12[%c0_45, %c0_46, %c0_47] : memref<1x128x128xbf16, #tpu.memory_space<vmem>>, vector<1x128x128xbf16>
    %96 = vector.shape_cast %95 : vector<1x128x128xbf16> to vector<128x128xbf16>
    %cst_48 = arith.constant dense<0.000000e+00> : vector<8x128xf32>
    %97 = tpu.matmul %94, %96, %cst_48 {dimension_numbers = #tpu.dot_dimension_numbers<[1], [0], [0], [1], [0, 0, 1, 1], [], []>} : vector<8x128xbf16>, vector<128x128xbf16>, vector<8x128xf32> -> vector<8x128xf32>
    %c0_49 = arith.constant 0 : index
    %c0_50 = arith.constant 0 : index
    %c0_51 = arith.constant 0 : index
    %98 = vector.load %arg13[%c0_49, %c0_50, %c0_51] : memref<1x1x128xf32, #tpu.memory_space<vmem>>, vector<1x1x128xf32>
    %99 = vector.shape_cast %98 : vector<1x1x128xf32> to vector<1x128xf32>
    %100 = vector.broadcast %99 : vector<1x128xf32> to vector<8x128xf32>
    %101 = arith.addf %97, %100 : vector<8x128xf32>
    %cst_52 = arith.constant 5.000000e-01 : f32
    %102 = vector.broadcast %cst_52 : f32 to vector<8x128xf32>
    %103 = arith.mulf %102, %101 : vector<8x128xf32>
    %cst_53 = arith.constant 4.471500e-02 : f32
    %104 = vector.broadcast %cst_53 : f32 to vector<8x128xf32>
    %105 = arith.mulf %104, %101 : vector<8x128xf32>
    %106 = arith.mulf %105, %101 : vector<8x128xf32>
    %107 = arith.mulf %106, %101 : vector<8x128xf32>
    %108 = arith.addf %101, %107 : vector<8x128xf32>
    %cst_54 = arith.constant 0.797884583 : f32
    %109 = vector.broadcast %cst_54 : f32 to vector<8x128xf32>
    %110 = arith.mulf %109, %108 : vector<8x128xf32>
    %111 = math.tanh %110 : vector<8x128xf32>
    %cst_55 = arith.constant 1.000000e+00 : f32
    %112 = vector.broadcast %cst_55 : f32 to vector<8x128xf32>
    %113 = arith.addf %112, %111 : vector<8x128xf32>
    %114 = arith.mulf %103, %113 : vector<8x128xf32>
    %115 = arith.truncf %114 : vector<8x128xf32> to vector<8x128xbf16>
    %c0_56 = arith.constant 0 : index
    %c0_57 = arith.constant 0 : index
    %c0_58 = arith.constant 0 : index
    %116 = vector.load %arg14[%c0_56, %c0_57, %c0_58] : memref<1x128x128xbf16, #tpu.memory_space<vmem>>, vector<1x128x128xbf16>
    %117 = vector.shape_cast %116 : vector<1x128x128xbf16> to vector<128x128xbf16>
    %cst_59 = arith.constant dense<0.000000e+00> : vector<8x128xf32>
    %118 = tpu.matmul %115, %117, %cst_59 {dimension_numbers = #tpu.dot_dimension_numbers<[1], [0], [0], [1], [0, 0, 1, 1], [], []>} : vector<8x128xbf16>, vector<128x128xbf16>, vector<8x128xf32> -> vector<8x128xf32>
    %c0_60 = arith.constant 0 : index
    %c0_61 = arith.constant 0 : index
    %c0_62 = arith.constant 0 : index
    %119 = vector.load %arg15[%c0_60, %c0_61, %c0_62] : memref<1x1x128xf32, #tpu.memory_space<vmem>>, vector<1x1x128xf32>
    %120 = vector.shape_cast %119 : vector<1x1x128xf32> to vector<1x128xf32>
    %121 = vector.broadcast %120 : vector<1x128xf32> to vector<8x128xf32>
    %122 = arith.addf %118, %121 : vector<8x128xf32>
    %123 = arith.addf %122, %93 : vector<8x128xf32>
    %c0_63 = arith.constant 0 : index
    %c0_64 = arith.constant 0 : index
    %c0_65 = arith.constant 0 : index
    %124 = vector.load %arg16[%c0_63, %c0_64, %c0_65] : memref<1x1x128xf32, #tpu.memory_space<vmem>>, vector<1x1x128xf32>
    %125 = vector.shape_cast %124 : vector<1x1x128xf32> to vector<1x128xf32>
    %c0_66 = arith.constant 0 : index
    %c0_67 = arith.constant 0 : index
    %c0_68 = arith.constant 0 : index
    %126 = vector.load %arg17[%c0_66, %c0_67, %c0_68] : memref<1x1x128xf32, #tpu.memory_space<vmem>>, vector<1x1x128xf32>
    %127 = vector.shape_cast %126 : vector<1x1x128xf32> to vector<1x128xf32>
    %cst_69 = arith.constant dense<0.000000e+00> : vector<8xf32>
    %128 = vector.multi_reduction <add>, %123, %cst_69 [1] : vector<8x128xf32> to vector<8xf32>
    %129 = vector.shape_cast %128 : vector<8xf32> to vector<8x1xf32>
    %cst_70 = arith.constant 1.562500e-02 : f32
    %130 = vector.broadcast %cst_70 : f32 to vector<8x1xf32>
    %131 = arith.mulf %129, %130 : vector<8x1xf32>
    %132 = vector.broadcast %131 : vector<8x1xf32> to vector<8x128xf32>
    %133 = arith.subf %123, %132 : vector<8x128xf32>
    %134 = arith.mulf %133, %133 : vector<8x128xf32>
    %cst_71 = arith.constant dense<0.000000e+00> : vector<8xf32>
    %135 = vector.multi_reduction <add>, %134, %cst_71 [1] : vector<8x128xf32> to vector<8xf32>
    %136 = vector.shape_cast %135 : vector<8xf32> to vector<8x1xf32>
    %cst_72 = arith.constant 6.400000e+01 : f32
    %137 = vector.broadcast %cst_72 : f32 to vector<8x1xf32>
    %138 = arith.mulf %137, %131 : vector<8x1xf32>
    %139 = arith.mulf %138, %131 : vector<8x1xf32>
    %140 = arith.subf %136, %139 : vector<8x1xf32>
    %cst_73 = arith.constant 1.562500e-02 : f32
    %141 = vector.broadcast %cst_73 : f32 to vector<8x1xf32>
    %142 = arith.mulf %140, %141 : vector<8x1xf32>
    %cst_74 = arith.constant 0.000000e+00 : f32
    %143 = vector.broadcast %cst_74 : f32 to vector<8x1xf32>
    %144 = arith.maximumf %142, %143 : vector<8x1xf32>
    %cst_75 = arith.constant 9.99999996E-13 : f32
    %145 = vector.broadcast %cst_75 : f32 to vector<8x1xf32>
    %146 = arith.addf %144, %145 : vector<8x1xf32>
    %147 = math.rsqrt %146 : vector<8x1xf32>
    %148 = vector.broadcast %147 : vector<8x1xf32> to vector<8x128xf32>
    %149 = arith.mulf %133, %148 : vector<8x128xf32>
    %150 = vector.broadcast %125 : vector<1x128xf32> to vector<8x128xf32>
    %151 = arith.mulf %149, %150 : vector<8x128xf32>
    %152 = vector.broadcast %127 : vector<1x128xf32> to vector<8x128xf32>
    %153 = arith.addf %151, %152 : vector<8x128xf32>
    %154 = arith.truncf %153 : vector<8x128xf32> to vector<8x128xbf16>
    %c0_76 = arith.constant 0 : index
    %c0_77 = arith.constant 0 : index
    %c0_78 = arith.constant 0 : index
    %155 = vector.load %arg18[%c0_76, %c0_77, %c0_78] : memref<1x8x128xbf16, #tpu.memory_space<vmem>>, vector<1x8x128xbf16>
    %156 = vector.shape_cast %155 : vector<1x8x128xbf16> to vector<8x128xbf16>
    %157 = vector.shape_cast %154 : vector<8x128xbf16> to vector<1x8x128xbf16>
    tpu.vector_store %arg18[%c0_76, %c0_77, %c0_78], %157 {strides = array<i32>} : memref<1x8x128xbf16, #tpu.memory_space<vmem>>, vector<1x8x128xbf16>,
    return
  }
  func.func @transform_0(%arg0: i32, %arg1: i32) -> (i32, i32, i32) {
    %c0_i32 = arith.constant 0 : i32
    %c0_i32_0 = arith.constant 0 : i32
    %c0_i32_1 = arith.constant 0 : i32
    return %arg0, %c0_i32, %c0_i32_0 : i32, i32, i32
  }
  func.func @transform_1(%arg0: i32, %arg1: i32) -> (i32, i32, i32) {
    %c0_i32 = arith.constant 0 : i32
    %c0_i32_0 = arith.constant 0 : i32
    %c0_i32_1 = arith.constant 0 : i32
    return %arg0, %c0_i32, %c0_i32_0 : i32, i32, i32
  }
  func.func @transform_2(%arg0: i32, %arg1: i32) -> (i32, i32) {
    %c0_i32 = arith.constant 0 : i32
    %c0_i32_0 = arith.constant 0 : i32
    %c0_i32_1 = arith.constant 0 : i32
    return %c0_i32, %c0_i32_0 : i32, i32
  }
  func.func @transform_3(%arg0: i32, %arg1: i32) -> (i32, i32) {
    %c0_i32 = arith.constant 0 : i32
    %c0_i32_0 = arith.constant 0 : i32
    %c0_i32_1 = arith.constant 0 : i32
    return %c0_i32, %c0_i32_0 : i32, i32
  }
  func.func @transform_4(%arg0: i32, %arg1: i32) -> (i32, i32, i32) {
    %c0_i32 = arith.constant 0 : i32
    %c0_i32_0 = arith.constant 0 : i32
    %c0_i32_1 = arith.constant 0 : i32
    return %arg1, %c0_i32, %c0_i32_0 : i32, i32, i32
  }
  func.func @transform_5(%arg0: i32, %arg1: i32) -> (i32, i32, i32) {
    %c0_i32 = arith.constant 0 : i32
    %c0_i32_0 = arith.constant 0 : i32
    %c0_i32_1 = arith.constant 0 : i32
    return %arg1, %c0_i32, %c0_i32_0 : i32, i32, i32
  }
  func.func @transform_6(%arg0: i32, %arg1: i32) -> (i32, i32, i32) {
    %c0_i32 = arith.constant 0 : i32
    %c0_i32_0 = arith.constant 0 : i32
    %c0_i32_1 = arith.constant 0 : i32
    return %arg1, %c0_i32, %c0_i32_0 : i32, i32, i32
  }
  func.func @transform_7(%arg0: i32, %arg1: i32) -> (i32, i32, i32) {
    %c0_i32 = arith.constant 0 : i32
    %c0_i32_0 = arith.constant 0 : i32
    %c0_i32_1 = arith.constant 0 : i32
    return %arg1, %c0_i32, %c0_i32_0 : i32, i32, i32
  }
  func.func @transform_8(%arg0: i32, %arg1: i32) -> (i32, i32, i32) {
    %c0_i32 = arith.constant 0 : i32
    %c0_i32_0 = arith.constant 0 : i32
    %c0_i32_1 = arith.constant 0 : i32
    return %arg1, %c0_i32, %c0_i32_0 : i32, i32, i32
  }
  func.func @transform_9(%arg0: i32, %arg1: i32) -> (i32, i32, i32) {
    %c0_i32 = arith.constant 0 : i32
    %c0_i32_0 = arith.constant 0 : i32
    %c0_i32_1 = arith.constant 0 : i32
    return %arg1, %c0_i32, %c0_i32_0 : i32, i32, i32
  }
  func.func @transform_10(%arg0: i32, %arg1: i32) -> (i32, i32, i32) {
    %c0_i32 = arith.constant 0 : i32
    %c0_i32_0 = arith.constant 0 : i32
    %c0_i32_1 = arith.constant 0 : i32
    return %arg1, %c0_i32, %c0_i32_0 : i32, i32, i32
  }
  func.func @transform_11(%arg0: i32, %arg1: i32) -> (i32, i32, i32) {
    %c0_i32 = arith.constant 0 : i32
    %c0_i32_0 = arith.constant 0 : i32
    %c0_i32_1 = arith.constant 0 : i32
    return %arg1, %c0_i32, %c0_i32_0 : i32, i32, i32
  }
  func.func @transform_12(%arg0: i32, %arg1: i32) -> (i32, i32, i32) {
    %c0_i32 = arith.constant 0 : i32
    %c0_i32_0 = arith.constant 0 : i32
    %c0_i32_1 = arith.constant 0 : i32
    return %arg1, %c0_i32, %c0_i32_0 : i32, i32, i32
  }
  func.func @transform_13(%arg0: i32, %arg1: i32) -> (i32, i32, i32) {
    %c0_i32 = arith.constant 0 : i32
    %c0_i32_0 = arith.constant 0 : i32
    %c0_i32_1 = arith.constant 0 : i32
    return %arg1, %c0_i32, %c0_i32_0 : i32, i32, i32
  }
  func.func @transform_14(%arg0: i32, %arg1: i32) -> (i32, i32, i32) {
    %c0_i32 = arith.constant 0 : i32
    %c0_i32_0 = arith.constant 0 : i32
    %c0_i32_1 = arith.constant 0 : i32
    return %arg1, %c0_i32, %c0_i32_0 : i32, i32, i32
  }
  func.func @transform_15(%arg0: i32, %arg1: i32) -> (i32, i32, i32) {
    %c0_i32 = arith.constant 0 : i32
    %c0_i32_0 = arith.constant 0 : i32
    %c0_i32_1 = arith.constant 0 : i32
    return %arg1, %c0_i32, %c0_i32_0 : i32, i32, i32
  }
  func.func @transform_16(%arg0: i32, %arg1: i32) -> (i32, i32, i32) {
    %c0_i32 = arith.constant 0 : i32
    %c0_i32_0 = arith.constant 0 : i32
    %c0_i32_1 = arith.constant 0 : i32
    return %arg0, %c0_i32, %c0_i32_0 : i32, i32, i32
  }
}

</mosaic_0001>

<bundles_post_ra>
// kernel: tpu_custom_call.1
= control target key start
LH: loop header
LB: loop body
LE: loop exit
PB: predicated region body
PF: predicated region fallthrough
CT: control target
= control target key end

     0   :  { %s3716_s0 = inlined_call_operand.hbm [shape: bf16[2,8,128], index: 0, kind: input, shape index: {}]   ;;  %s3717_s1 = inlined_call_operand.vmem [shape: f32[2,1,8], index: 1, kind: input, shape index: {}]   ;;  %s3718_s2 = inlined_call_operand.hbm [shape: f32[1,128], index: 2, kind: input, shape index: {}]   ;;  %s3719_s3 = inlined_call_operand.hbm [shape: f32[1,128], index: 3, kind: input, shape index: {}]   ;;  %s3720_s4 = inlined_call_operand.hbm [shape: bf16[2,128,384], index: 4, kind: input, shape index: {}]   ;;  %s3721_s5 = inlined_call_operand.vmem [shape: f32[2,1,384], index: 5, kind: input, shape index: {}]   ;;  %s3722_s6 = inlined_call_operand.hbm [shape: bf16[2,128,128], index: 6, kind: input, shape index: {}]   ;;  %s3723_s7 = inlined_call_operand.vmem [shape: f32[2,1,128], index: 7, kind: input, shape index: {}]   ;;  %s3724_s8 = inlined_call_operand.vmem [shape: f32[2,1,128], index: 8, kind: input, shape index: {}]   ;;  %s3725_s9 = inlined_call_operand.vmem [shape: f32[2,1,128], index: 9, kind: input, shape index: {}]   ;;  %s3726_s10 = inlined_call_operand.hbm [shape: bf16[2,128,128], index: 10, kind: input, shape index: {}]   ;;  %s3727_s11 = inlined_call_operand.vmem [shape: f32[2,1,128], index: 11, kind: input, shape index: {}]   ;;  %s3728_s12 = inlined_call_operand.hbm [shape: bf16[2,128,128], index: 12, kind: input, shape index: {}]   ;;  %s3729_s13 = inlined_call_operand.vmem [shape: f32[2,1,128], index: 13, kind: input, shape index: {}]   ;;  %s3730_s14 = inlined_call_operand.vmem [shape: f32[2,1,128], index: 14, kind: input, shape index: {}]   ;;  %s3731_s15 = inlined_call_operand.vmem [shape: f32[2,1,128], index: 15, kind: input, shape index: {}]   ;;  %s3732_s16 = inlined_call_operand.hbm [shape: bf16[2,8,128], index: 16, kind: output, shape index: {}]  }
   0x1   :  { %3773 = sst [smem:[#allocation39_spill]] %s3716_s0 }
   0x2   :  { %3774 = sst [smem:[#allocation40_spill]] %s3717_s1 }
   0x3   :  { %3775 = sst [smem:[#allocation41_spill]] %s3718_s2 }
   0x4   :  { %3776 = sst [smem:[#allocation42_spill]] %s3719_s3 }
   0x5   :  { %3777 = sst [smem:[#allocation43_spill]] %s3720_s4 }
   0x6   :  { %3778 = sst [smem:[#allocation44_spill]] %s3721_s5 }
   0x7   :  { %3779 = sst [smem:[#allocation45_spill]] %s3722_s6 }
   0x8   :  { %3780 = sst [smem:[#allocation46_spill]] %s3723_s7 }
   0x9   :  { %3781 = sst [smem:[#allocation47_spill]] %s3724_s8 }
   0xa   :  { %3782 = sst [smem:[#allocation48_spill]] %s3725_s9 }
   0xb   :  { %3783 = sst [smem:[#allocation49_spill]] %s3726_s10 }
   0xc   :  { %3784 = sst [smem:[#allocation50_spill]] %s3727_s11 }
   0xd   :  { %3785 = sst [smem:[#allocation51_spill]] %s3728_s12 }
   0xe   :  { %3786 = sst [smem:[#allocation52_spill]] %s3729_s13 }
   0xf   :  { %3787 = sst [smem:[#allocation53_spill]] %s3730_s14 }
  0x10   :  { %3788 = sst [smem:[#allocation54_spill]] %s3731_s15 }
  0x11   :  { %3789 = sst [smem:[#allocation55_spill]] %s3732_s16 }
  0x12   :  { %21 = vsyncpa [#allocation4], 0 }
  0x13   :  { %23 = vsyncpa [#allocation4 + $0x1], 0 }
  0x14   :  { %24 = vsyncpa [#allocation7], 0 }
  0x15   :  { %25 = vsyncpa [#allocation10], 0 }
  0x16   :  { %27 = vsyncpa [#allocation10 + $0x1], 0 }
  0x17   :  { %28 = vsyncpa [#allocation13], 0 }
  0x18   :  { %30 = vsyncpa [#allocation13 + $0x1], 0 }
  0x19   :  { %31 = vsyncpa [#allocation5], 0 }
  0x1a   :  { %33 = vsyncpa [#allocation5 + $0x1], 0  ;;  %s3004_s21 = smov 0   ;;  %s3006_s22 = smov 0  }
  0x1b   :  { %s3008_s23 = smov 0   ;;  %s3010_s24 = smov 0  }
  0x1c   :  { %s3012_s25 = smov 0   ;;  %s3014_s26 = smov 0  }
  0x1d   :  { %s3016_s27 = smov 0   ;;  %s3018_s28 = smov 0  }
  0x1e   :  { %s3020_s29 = smov 0   ;;  %s3022_s30 = smov 0  }
  0x1f   :  { %s3024_s0 = smov 0  }
  0x20 LB: > { %3790 = sst [smem:[#allocation21_spill]] %s2865_s22  ;;  %s3058_s17 = sadd.s32 4294967295, %s2901_s0   ;;  %s2901_s0 = sphi %s3024_s0, %s39_s0   ;;  %s2897_s30 = sphi %s3022_s30, %s3892_s30   ;;  %s2893_s29 = sphi %s3020_s29, %s3891_s29   ;;  %s2889_s28 = sphi %s3018_s28, %s3890_s28   ;;  %s2885_s27 = sphi %s3016_s27, %s3889_s27   ;;  %s2881_s26 = sphi %s3014_s26, %s3888_s26   ;;  %s2877_s25 = sphi %s3012_s25, %s3887_s25   ;;  %s2873_s24 = sphi %s3010_s24, %s3886_s24   ;;  %s2869_s23 = sphi %s3008_s23, %s3885_s23   ;;  %s2865_s22 = sphi %s3006_s22, %s3884_s22   ;;  %s2861_s21 = sphi %s3004_s21, %s3883_s21  }
  0x21   : > { %3791 = sst [smem:[#allocation22_spill]] %s2869_s23  ;;  %p165_p0 = scmp.ne.s32.totalorder %s2865_s22, %s2861_s21 }
  0x22   : > { %3792 = sst [smem:[#allocation23_spill]] %s2873_s24  ;;  %p3735_p1 = scmp.eq.s32.totalorder %s3058_s17, 0 }
  0x23   : > { %3793 = sst [smem:[#allocation24_spill]] %s2877_s25  ;;  %p2092_p3 = scmp.ge.s32.totalorder %s2901_s0, 1 }
  0x24   : > { %3794 = sst [smem:[#allocation25_spill]] %s2881_s26  ;;  %p488_p4 = scmp.lt.s32.totalorder %s2901_s0, 5 }
  0x25   : > { %3795 = sst [smem:[#allocation26_spill]] %s2885_s27  ;;  %p3067_p5 = por %p165_p0, %p3735_p1 }
  0x26   : > { %3796 = sst [smem:[#allocation27_spill]] %s2889_s28  ;;  %p3071_p6 = pnand %p2092_p3, %p488_p4 }
  0x27   : > { %3797 = sst [smem:[#allocation28_spill]] %s2893_s29  ;;  %s2903_s20 = smov [#allocation6]  }
  0x28   : > { %3798 = sst [smem:[#allocation29_spill]] %s2897_s30  ;;  %s501_s16 = sshll.u32 %s2903_s20, 4  ;;  %s502_s16 = int_to_ptr.vmem [resolvable:$true] %s501_s16 }
  0x29   : > { %3799 = sst [smem:[#allocation30_spill]] %s2901_s0  ;;  %p2358_p7 = pneg %p3071_p6 }
  0x2a   : > { %s3800_s18 = scalar_select %p3067_p5, 1, 0 }
  0x2b   : > { %s3802_s19 = scalar_select %p3071_p6, 1, 0 }
  0x2c   : > { %3801 = sst [smem:[#allocation31_spill]] %s3800_s18  ;;  %p3079_p8 = pnand %p2358_p7, %p3735_p1 }
  0x2d   : > { %3803 = sst [smem:[#allocation32_spill]] %s3802_s19  ;;  %s3805_s2 = sld [smem:[#allocation41_spill]] }
  0x2e   : > { %s3804_s21 = scalar_select %p3079_p8, 1, 0 }
  0x2f   : > { %p3740_p11 = pneg %p3079_p8 }
  0x33   : > { %s2561_s11 = scalar_lea.hbm %s3805_s2, 16 }
  0x34   : > { %p2562_p10 = scmp.ne.s32.totalorder %s3805_s2, %s2561_s11  ;;  %p2568_p0 = scmp.lt.u32.totalorder %s2561_s11, %s3805_s2 }
  0x36   : > { %p2564_p12 = pnand %p3740_p11, %p2562_p10 }
  0x38   : > { %p2565_p13 = pneg %p2564_p12 }
  0x3a   : > { %p2570_p3 = pnand %p2568_p0, %p2565_p13 }
  0x3c   : > { %2573 = shalt.err (!%p2570_p3)
}
  0x3d   : > { %s2574_s15 = scalar_lea.vmem %s502_s16, 16  ;;  %s2581_s5 = scalar_lea.vmem %s502_s16, 32 }
  0x3e   : > { %p2575_p4 = scmp.ne.s32.totalorder %s502_s16, %s2574_s15  ;;  %p2582_p1 = scmp.lt.s32.totalorder %s502_s16, %s502_s16 }
  0x3f   : > { %p2583_p9 = scmp.lt.s32.totalorder %s2581_s5, %s2574_s15 }
  0x40   : > { %p2577_p7 = pnand %p2575_p4, %p3740_p11 }
  0x41   : > { %p2584_p5 = por %p2583_p9, %p2582_p1 }
  0x42   : > { %p2578_p2 = pneg %p2577_p7 }
  0x44   : > { %p2585_p6 = pnand %p2584_p5, %p2578_p2 }
  0x46   : > { %2588 = shalt.err (!%p2585_p6)
}
  0x47   : > { %2361 = dma.hbm_to_vmem [thread:$0]  (!%p3079_p8), %s3805_s2, 16, %s502_s16, [#allocation7]  }
  0x48   : > { %p159_p1 = scmp.ne.s32.totalorder %s2869_s23, %s2865_s22  ;;  %p3739_p2 = scmp.lt.s32.totalorder %s2901_s0, 4 }
  0x49   : > { %p3806_p5 = scmp.eq.s32.totalorder %s2901_s0, 0  ;;  %s549_s14 = sand.u32 1, %s2869_s23  }
  0x4a   : > { %s2335_s15 = smul.u32 3072, %s2893_s29  ;;  %s3808_s4 = sld [smem:[#allocation43_spill]] }
  0x4b   : > { %p161_p6 = por %p159_p1, %p3806_p5  ;;  %s2334_s20 = smul.u32 192, %s549_s14 }
  0x4c   : > { %s3129_s13 = sshll.u32 %s549_s14, 6  ;;  %s3809_s2 = sand.u32 1, %s2901_s0  }
  0x4d   : > { %p3118_p9 = pnand %p3739_p2, %p161_p6  ;;  %s551_s16 = scalar_lea.vmem [#allocation9], %s2334_s20 }
  0x4e   : > { %s558_s11 = sshll.u32 %s551_s16, 4  ;;  %s3133_s1 = scalar_lea.sflag [#allocation10], %s3809_s2  ;;  %s3127_s11 = int_to_ptr.vmem [resolvable:$true] %s558_s11 }
  0x4f   : > { %s3807_s5 = scalar_select %p3118_p9, 1, 0 }
  0x50   : > { %s3125_s7 = scalar_lea.hbm %s3808_s4, %s2335_s15  ;;  %p3139_p12 = pneg %p3118_p9 }
  0x51   : > { %s2589_s27 = scalar_lea.hbm %s3125_s7, 3072  ;;  %s2594_s8 = scalar_lea.hbm %s3808_s4, 6144 }
  0x52   : > { %p2590_p10 = scmp.ne.s32.totalorder %s3125_s7, %s2589_s27  ;;  %p2595_p3 = scmp.lt.u32.totalorder %s3125_s7, %s3808_s4 }
  0x53   : > { %s3810_s9 = scalar_select %p3139_p12, 1, 0 }
  0x54   : > { %p2592_p13 = pnand %p3139_p12, %p2590_p10  ;;  %p2596_p4 = scmp.lt.u32.totalorder %s2594_s8, %s2589_s27 }
  0x55   : > { %p2598_p1 = scmp.lt.u32.totalorder %s2589_s27, %s3125_s7 }
  0x56   : > { %p2593_p0 = pneg %p2592_p13  ;;  %p2597_p7 = por %p2596_p4, %p2595_p3 }
  0x58   : > { %p2599_p5 = por %p2598_p1, %p2597_p7 }
  0x5a   : > { %p2600_p6 = pnand %p2599_p5, %p2593_p0 }
  0x5c   : > { %2603 = shalt.err (!%p2600_p6)
}
  0x5d   : > { %s2604_s2 = scalar_lea.vmem %s3127_s11, 3072  ;;  %s2904_s15 = smov [#allocation9]  }
  0x5e   : > { %p2605_p10 = scmp.ne.s32.totalorder %s3127_s11, %s2604_s2  ;;  %s2609_s20 = sshll.u32 %s2904_s15, 4  ;;  %s2610_s20 = int_to_ptr.vmem [resolvable:$false] %s2609_s20 }
  0x5f   : > { %s2611_s14 = scalar_lea.vmem %s2610_s20, 6144  ;;  %p2612_p11 = scmp.lt.s32.totalorder %s3127_s11, %s2610_s20 }
  0x60   : > { %p2607_p13 = pnand %p2605_p10, %p3139_p12  ;;  %p2613_p8 = scmp.lt.s32.totalorder %s2611_s14, %s2604_s2 }
  0x62   : > { %p2608_p2 = pneg %p2607_p13  ;;  %p2614_p3 = por %p2613_p8, %p2612_p11 }
  0x64   : > { %p2615_p4 = pnand %p2614_p3, %p2608_p2 }
  0x66   : > { %2618 = shalt.err (!%p2615_p4)
}
  0x67   : > { %s2905_s27 = smov 192   ;;  %s2906_s8 = smov 12  }
  0x68   : > { %2371 = dma.hbm_to_vmem [thread:$0]  (!%p3118_p9), %s3125_s7, 3072, %s3127_s11, %s3133_s1, %s2905_s27, %s2905_s27, %s2906_s8  }
  0x69   : > { %s3164_s16 = sshll.u32 %s2893_s29, 10  ;;  %s3811_s10 = sld [smem:[#allocation49_spill]] }
  0x6a   : > { %s618_s14 = scalar_lea.vmem [#allocation12], %s3129_s13  ;;  %s2907_s28 = smov [#allocation8]  }
  0x6b   : > { %s625_s4 = sshll.u32 %s618_s14, 4  ;;  %s3175_s18 = sshll.u32 %s2907_s28, 4  ;;  %s3173_s4 = int_to_ptr.vmem [resolvable:$true] %s625_s4  ;;  %s513_s18 = int_to_ptr.vmem [resolvable:$true] %s3175_s18 }
  0x6c   : > { %s3812_s7 = sand.u32 1, %s2901_s0  }
  0x6d   : > { %s3179_s11 = scalar_lea.sflag [#allocation13], %s3812_s7 }
  0x6f   : > { %s3170_s20 = scalar_lea.hbm %s3811_s10, %s3164_s16  ;;  %s2624_s2 = scalar_lea.hbm %s3811_s10, 2048 }
  0x70   : > { %s2619_s27 = scalar_lea.hbm %s3170_s20, 1024  ;;  %p2625_p0 = scmp.lt.u32.totalorder %s3170_s20, %s3811_s10 }
  0x71   : > { %p2620_p8 = scmp.ne.s32.totalorder %s3170_s20, %s2619_s27  ;;  %p2626_p7 = scmp.lt.u32.totalorder %s2624_s2, %s2619_s27 }
  0x72   : > { %p2628_p5 = scmp.lt.u32.totalorder %s2619_s27, %s3170_s20 }
  0x73   : > { %p2622_p11 = pnand %p2620_p8, %p3139_p12  ;;  %p2627_p1 = por %p2626_p7, %p2625_p0 }
  0x75   : > { %p2623_p2 = pneg %p2622_p11  ;;  %p2629_p6 = por %p2628_p5, %p2627_p1 }
  0x77   : > { %p2630_p10 = pnand %p2629_p6, %p2623_p2 }
  0x79   : > { %2633 = shalt.err (!%p2630_p10)
}
  0x7a   : > { %s2634_s28 = scalar_lea.vmem %s3173_s4, 1024  ;;  %s2908_s14 = smov [#allocation12]  }
  0x7b   : > { %p2635_p13 = scmp.ne.s32.totalorder %s3173_s4, %s2634_s28  ;;  %s2639_s7 = sshll.u32 %s2908_s14, 4  ;;  %s2640_s7 = int_to_ptr.vmem [resolvable:$false] %s2639_s7 }
  0x7c   : > { %s2641_s22 = scalar_lea.vmem %s2640_s7, 2048  ;;  %p2642_p8 = scmp.lt.s32.totalorder %s3173_s4, %s2640_s7 }
  0x7d   : > { %p2637_p3 = pnand %p2635_p13, %p3139_p12  ;;  %p2643_p11 = scmp.lt.s32.totalorder %s2641_s22, %s2634_s28 }
  0x7f   : > { %p2638_p4 = pneg %p2637_p3  ;;  %p2644_p0 = por %p2643_p11, %p2642_p8 }
  0x81   : > { %p2645_p7 = pnand %p2644_p0, %p2638_p4 }
  0x83   : > { %2648 = shalt.err (!%p2645_p7)
}
  0x84   : > { %s3752_s19 = smov 64   ;;  %s3754_s27 = smov 4  }
  0x85   : > { %2377 = dma.hbm_to_vmem [thread:$0]  (!%p3118_p9), %s3170_s20, 1024, %s3173_s4, %s3179_s11, %s3752_s19, %s3752_s19, %s3754_s27  }
  0x86   : > { %s3813_s3 = sld [smem:[#allocation42_spill]]  ;;  %p3814_p1 = scmp.ne.s32.totalorder %s3804_s21, 0 }
  0x88   : > { %p3815_p5 = pneg %p3814_p1 }
  0x8c   : > { %s2649_s2 = scalar_lea.hbm %s3813_s3, 16 }
  0x8d   : > { %p2650_p2 = scmp.ne.s32.totalorder %s3813_s3, %s2649_s2  ;;  %p2656_p13 = scmp.lt.u32.totalorder %s2649_s2, %s3813_s3 }
  0x8f   : > { %p2652_p6 = pnand %p2650_p2, %p3815_p5 }
  0x91   : > { %p2653_p10 = pneg %p2652_p6 }
  0x93   : > { %p2658_p3 = pnand %p2656_p13, %p2653_p10 }
  0x95   : > { %2661 = shalt.err (!%p2658_p3)
}
  0x96   : > { %s2662_s4 = scalar_lea.vmem %s513_s18, 16  ;;  %p3816_p8 = pmov %p3815_p5 }
  0x97   : > { %p2663_p4 = scmp.ne.s32.totalorder %s513_s18, %s2662_s4  ;;  %s2669_s20 = scalar_lea.vmem %s513_s18, 32 }
  0x98   : > { %p2670_p7 = scmp.lt.s32.totalorder %s513_s18, %s513_s18  ;;  %p2671_p9 = scmp.lt.s32.totalorder %s2669_s20, %s2662_s4 }
  0x99   : > { %p2665_p11 = pnand %p2663_p4, %p3816_p8 }
  0x9a   : > { %p2672_p12 = por %p2671_p9, %p2670_p7 }
  0x9b   : > { %p2666_p0 = pneg %p2665_p11 }
  0x9d   : > { %p2673_p2 = pnand %p2672_p12, %p2666_p0 }
  0x9f   : > { %2676 = shalt.err (!%p2673_p2)
}
  0xa0   : > { %2364 = dma.hbm_to_vmem [thread:$0]  (!%p3814_p1), %s3813_s3, 16, %s513_s18, [#allocation7]  }
  0xa1   : > { %s2091_s21 = sadd.s32 4294967294, %s2901_s0   ;;  %s3817_s2 = sadd.s32 1, %s2893_s29 }
  0xa2   : > { %p49_p9 = scmp.ge.s32.totalorder %s3817_s2, 2  ;;  %s51_s28 = sadd.s32 1, %s2897_s30 }
  0xa3   : > { %s58_s14 = sadd.s32 1, %s2881_s26  ;;  %p65_p12 = scmp.ne.s32.totalorder %s2881_s26, %s2877_s25 }
  0xa4   : > { %s3818_s7 = smov %s3817_s2  ;;  %s3896_s28 = smov (!%p49_p9, %s51_s28), %s2897_s30 }
  0xa5   : > { %s3894_s7 = smov (%p49_p9, %s3818_s7), 0  ;;  %p3820_p5 = scmp.eq.s32.totalorder %s2901_s0, 0 }
  0xa6   : > { %3819 = sst [smem:[#allocation33_spill]] %s3894_s7  ;;  %p71_p6 = scmp.ne.s32.totalorder %s2877_s25, %s2873_s24 }
  0xa7   : > { %p3241_p1 = por %p3820_p5, %p65_p12  ;;  %p53_p10 = scmp.ge.s32.totalorder %s3896_s28, 2 }
  0xa8   : > { %s149_s22 = ssub.s32 %s2893_s29, %s3894_s7  ;;  %p3822_p13 = scmp.eq.s32.totalorder %s3058_s17, 0 }
  0xa9   : > { %p150_p4 = scmp.eq.s32.totalorder %s149_s22, 0  ;;  %s3898_s28 = smov (%p53_p10, %s3896_s28), 0 }
  0xaa   : > { %p3254_p3 = por %p3822_p13, %p71_p6  ;;  %3824 = sst [smem:[#allocation34_spill]] %s3898_s28 }
  0xab   : > { %s3825_s20 = sadd.s32 1, %s2869_s23  ;;  %s55_s15 = ssub.s32 %s2897_s30, %s3898_s28 }
  0xac   : > { %s3823_s4 = scalar_select %p3254_p3, 1, 0 }
  0xad   : > { %s3263_s8 = scalar_select %p150_p4, %s2869_s23, %s3825_s20  }
  0xae   : > { %p3827_p8 = scmp.eq.s32.totalorder %s3058_s17, 3  ;;  %p56_p0 = scmp.eq.s32.totalorder %s55_s15, 0 }
  0xaf   : > { %3826 = sst [smem:[#allocation35_spill]] %s3263_s8  ;;  %p481_p7 = scmp.eq.s32.totalorder %s2091_s21, 3 }
  0xb0   : > { %p3269_p11 = por %p3827_p8, %p65_p12  ;;  %s523_s19 = sand.u32 1, %s2881_s26  }
  0xb1   : > { %s2097_s27 = sshll.u32 %s2897_s30, 6  ;;  %p3281_p2 = por %p481_p7, %p71_p6 }
  0xb2   : > { %s3828_s2 = scalar_select %p3269_p11, 1, 0 }
  0xb3   : > { %s3276_s3 = scalar_select %p56_p0, %s2881_s26, %s58_s14  }
  0xb4   : > { %3829 = sst [smem:[#allocation36_spill]] %s3828_s2  ;;  %s2096_s10 = sshll.u32 %s523_s19, 2 }
  0xb5   : > { %3830 = sst [smem:[#allocation37_spill]] %s3276_s3  ;;  %s3833_s28 = sld [smem:[#allocation39_spill]] }
  0xb6   : > { %s3831_s22 = scalar_select %p3281_p2, 1, 0 }
  0xb7   : > { %p3835_p9 = scmp.lt.s32.totalorder %s2901_s0, 4  ;;  %s527_s14 = scalar_lea.vmem [#allocation3], %s2096_s10 }
  0xb8   : > { %3832 = sst [smem:[#allocation38_spill]] %s3831_s22  ;;  %s534_s15 = sshll.u32 %s527_s14, 4  ;;  %s3298_s15 = int_to_ptr.vmem [resolvable:$true] %s534_s15 }
  0xb9   : > { %p3294_p12 = pnand %p3835_p9, %p3241_p1  ;;  %s524_s30 = scalar_lea.sflag [#allocation4], %s523_s19 }
  0xbb   : > { %s3834_s8 = smov %s3833_s28  ;;  %s3288_s29 = scalar_lea.hbm %s3833_s28, %s2097_s27 }
  0xbc   : > { %s2677_s7 = scalar_lea.hbm %s3288_s29, 64  ;;  %p2679_p6 = pneg %p3294_p12 }
  0xbd   : > { %p2678_p5 = scmp.ne.s32.totalorder %s3288_s29, %s2677_s7  ;;  %s2682_s18 = scalar_lea.hbm %s3834_s8, 128 }
  0xbe   : > { %p2683_p1 = scmp.lt.u32.totalorder %s3288_s29, %s3834_s8  ;;  %p2684_p4 = scmp.lt.u32.totalorder %s2682_s18, %s2677_s7 }
  0xbf   : > { %p2680_p10 = pnand %p2679_p6, %p2678_p5  ;;  %p2686_p0 = scmp.lt.u32.totalorder %s2677_s7, %s3288_s29 }
  0xc0   : > { %p2685_p8 = por %p2684_p4, %p2683_p1 }
  0xc1   : > { %p2681_p13 = pneg %p2680_p10 }
  0xc2   : > { %p2687_p7 = por %p2686_p0, %p2685_p8 }
  0xc4   : > { %p2688_p9 = pnand %p2687_p7, %p2681_p13 }
  0xc6   : > { %2691 = shalt.err (!%p2688_p9)
}
  0xc7   : > { %s2692_s10 = scalar_lea.vmem %s3298_s15, 64  ;;  %s2911_s19 = smov [#allocation3]  }
  0xc8   : > { %p2693_p5 = scmp.ne.s32.totalorder %s3298_s15, %s2692_s10  ;;  %s2697_s14 = sshll.u32 %s2911_s19, 4  ;;  %s2698_s14 = int_to_ptr.vmem [resolvable:$false] %s2697_s14 }
  0xc9   : > { %s2699_s3 = scalar_lea.vmem %s2698_s14, 128  ;;  %p2700_p11 = scmp.lt.s32.totalorder %s3298_s15, %s2698_s14 }
  0xca   : > { %p2695_p10 = pnand %p2693_p5, %p2679_p6  ;;  %p2701_p1 = scmp.lt.s32.totalorder %s2699_s3, %s2692_s10 }
  0xcc   : > { %p2696_p2 = pneg %p2695_p10  ;;  %p2702_p4 = por %p2701_p1, %p2700_p11 }
  0xce   : > { %p2703_p8 = pnand %p2702_p4, %p2696_p2 }
  0xd0   : > { %2706 = shalt.err (!%p2703_p8)
}
  0xd1   : > { %2368 = dma.hbm_to_vmem [thread:$0]  (!%p3294_p12), %s3288_s29, 64, %s3298_s15, %s524_s30  }
  0xd2   : > { %s3837_s6 = sld [smem:[#allocation45_spill]]  ;;  %s579_s18 = scalar_lea.vmem [#allocation11], %s3129_s13 }
  0xd3   : > { %s586_s20 = sshll.u32 %s579_s18, 4  ;;  %p3838_p2 = scmp.ne.s32.totalorder %s3810_s9, 0  ;;  %s3332_s20 = int_to_ptr.vmem [resolvable:$true] %s586_s20 }
  0xd8   : > { %s3329_s28 = scalar_lea.hbm %s3837_s6, %s3164_s16  ;;  %s2712_s30 = scalar_lea.hbm %s3837_s6, 2048 }
  0xd9   : > { %s2707_s21 = scalar_lea.hbm %s3329_s28, 1024  ;;  %p2713_p12 = scmp.lt.u32.totalorder %s3329_s28, %s3837_s6 }
  0xda   : > { %p2708_p11 = scmp.ne.s32.totalorder %s3329_s28, %s2707_s21  ;;  %p2714_p0 = scmp.lt.u32.totalorder %s2712_s30, %s2707_s21 }
  0xdb   : > { %p2716_p9 = scmp.lt.u32.totalorder %s2707_s21, %s3329_s28 }
  0xdc   : > { %p2710_p6 = pnand %p2708_p11, %p3838_p2  ;;  %p2715_p7 = por %p2714_p0, %p2713_p12 }
  0xde   : > { %p2711_p13 = pneg %p2710_p6  ;;  %p2717_p5 = por %p2716_p9, %p2715_p7 }
  0xe0   : > { %p2718_p10 = pnand %p2717_p5, %p2711_p13 }
  0xe2   : > { %2721 = shalt.err (!%p2718_p10)
}
  0xe3   : > { %s2722_s14 = scalar_lea.vmem %s3332_s20, 1024  ;;  %s2912_s3 = smov [#allocation11]  }
  0xe4   : > { %p2723_p1 = scmp.ne.s32.totalorder %s3332_s20, %s2722_s14  ;;  %s2727_s7 = sshll.u32 %s2912_s3, 4  ;;  %s2728_s7 = int_to_ptr.vmem [resolvable:$false] %s2727_s7 }
  0xe5   : > { %s2729_s27 = scalar_lea.vmem %s2728_s7, 2048  ;;  %p2730_p11 = scmp.lt.s32.totalorder %s3332_s20, %s2728_s7 }
  0xe6   : > { %p2725_p4 = pnand %p2723_p1, %p3838_p2  ;;  %p2731_p6 = scmp.lt.s32.totalorder %s2729_s27, %s2722_s14 }
  0xe8   : > { %p2726_p8 = pneg %p2725_p4  ;;  %p2732_p12 = por %p2731_p6, %p2730_p11 }
  0xea   : > { %p2733_p0 = pnand %p2732_p12, %p2726_p8 }
  0xec   : > { %2736 = shalt.err (!%p2733_p0)
}
  0xed   : > { %p3839_p13 = scmp.ne.s32.totalorder %s3807_s5, 0  ;;  %s3840_s18 = smov 4  }
  0xee   : > { %s3841_s21 = smov 64   ;;  %s3842_s12 = sld [smem:[#allocation51_spill]] }
  0xef   : > { %2374 = dma.hbm_to_vmem [thread:$0]  (!%p3839_p13), %s3329_s28, 1024, %s3332_s20, %s3133_s1, %s3841_s21, %s3841_s21, %s3840_s18  }
  0xf0   : > { %s645_s15 = scalar_lea.vmem [#allocation14], %s3129_s13 }
  0xf1   : > { %s652_s19 = sshll.u32 %s645_s15, 4  ;;  %s3366_s19 = int_to_ptr.vmem [resolvable:$true] %s652_s19 }
  0xf4   : > { %s3363_s30 = scalar_lea.hbm %s3842_s12, %s3164_s16  ;;  %s2742_s28 = scalar_lea.hbm %s3842_s12, 2048 }
  0xf5   : > { %s2737_s14 = scalar_lea.hbm %s3363_s30, 1024  ;;  %p2743_p10 = scmp.lt.u32.totalorder %s3363_s30, %s3842_s12 }
  0xf6   : > { %p2738_p7 = scmp.ne.s32.totalorder %s3363_s30, %s2737_s14  ;;  %p2744_p1 = scmp.lt.u32.totalorder %s2742_s28, %s2737_s14 }
  0xf7   : > { %p2746_p8 = scmp.lt.u32.totalorder %s2737_s14, %s3363_s30 }
  0xf8   : > { %p2740_p9 = pnand %p2738_p7, %p3838_p2  ;;  %p2745_p4 = por %p2744_p1, %p2743_p10 }
  0xfa   : > { %p2741_p5 = pneg %p2740_p9  ;;  %p2747_p11 = por %p2746_p8, %p2745_p4 }
  0xfc   : > { %p2748_p6 = pnand %p2747_p11, %p2741_p5 }
  0xfe   : > { %2751 = shalt.err (!%p2748_p6)
}
  0xff   : > { %s2752_s13 = scalar_lea.vmem %s3366_s19, 1024  ;;  %s2913_s7 = smov [#allocation14]  }
 0x100   : > { %p2753_p12 = scmp.ne.s32.totalorder %s3366_s19, %s2752_s13  ;;  %s2757_s27 = sshll.u32 %s2913_s7, 4  ;;  %s2758_s27 = int_to_ptr.vmem [resolvable:$false] %s2757_s27 }
 0x101   : > { %s2759_s10 = scalar_lea.vmem %s2758_s27, 2048  ;;  %p2760_p9 = scmp.lt.s32.totalorder %s3366_s19, %s2758_s27 }
 0x102   : > { %p2755_p0 = pnand %p2753_p12, %p3838_p2  ;;  %p2761_p3 = scmp.lt.s32.totalorder %s2759_s10, %s2752_s13 }
 0x104   : > { %p2756_p7 = pneg %p2755_p0  ;;  %p2762_p10 = por %p2761_p3, %p2760_p9 }
 0x106   : > { %p2763_p1 = pnand %p2762_p10, %p2756_p7 }
 0x108   : > { %2766 = shalt.err (!%p2763_p1)
}
 0x109   : > { %2380 = dma.hbm_to_vmem [thread:$0]  (!%p3839_p13), %s3363_s30, 1024, %s3366_s19, %s3179_s11, %s3841_s21, %s3841_s21, %s3840_s18  }
 0x10a   : > { %s3843_s9 = sld [smem:[#allocation32_spill]] }
 0x110   : > { %p3844_p2 = scmp.ne.s32.totalorder %s3843_s9, 0 }
 0x111   : > { %s3396_s29 = sand.u32 (!%p3844_p2), 1, %s2877_s25   ;;  %p3845_p3 = scmp.ne.s32.totalorder (!%p3844_p2), %s3823_s4, 0 }
 0x112   : > { %682 = sbr.rel (%p3844_p2) target bundleno = 3614 (0xe1e), region = 84  ;;  %s3762_s15 = sshll.u32 (!%p3844_p2), %s3396_s29, 2 }
 0x113   : > { %s685_s14 = scalar_lea.sflag (!%p3844_p2), [#allocation4], %s3396_s29  ;;  %s3402_s5 = scalar_lea.vmem (!%p3844_p2), [#allocation3], %s3762_s15 }
 0x119   : > { %2840 = dma.done.wait (%p3845_p3), %s685_s14, 64  }
 0x11a   : > { %2842 = vsyncadd (%p3845_p3), %s685_s14, 4294967232  ;;  %p3846_p13 = scmp.eq.s32.totalorder %s3058_s17, 0 }
 0x11c   : > { %2844 = dma.done.wait (%p3846_p13), [#allocation7], 32   ;;  %p3847_p5 = pmov %p3846_p13 }
 0x11d   : > { %s3848_s11 = sld [smem:[#allocation21_spill]]  ;;  %s3849_s18 = sld [smem:[#allocation31_spill]] }
 0x11e   : > { %2846 = vsyncadd (%p3847_p5), [#allocation7], 4294967264  ;;  %s701_s21 = sand.u32 1, %s3058_s17  }
 0x11f   : > { %s702_s3 = scalar_lea.sflag [#allocation10], %s701_s21 }
 0x123   : > { %s703_s30 = sand.u32 1, %s3848_s11   ;;  %p3850_p4 = scmp.ne.s32.totalorder %s3849_s18, 0 }
 0x124   : > { %s2336_s19 = smul.u32 192, %s703_s30 }
 0x126   : > { %s3414_s1 = scalar_lea.vmem [#allocation9], %s2336_s19 }
 0x127   : > { %2848 = dma.done.wait (%p3850_p4), %s702_s3, 4096  }
 0x128   : > { %2850 = vsyncadd (%p3850_p4), %s702_s3, 4294963200  ;;  %s2112_s4 = sshll.u32 %s703_s30, 6  ;;  %s720_s20 = scalar_lea.sflag [#allocation13], %s701_s21 }
 0x129   : > { %s3420_s28 = scalar_lea.vmem [#allocation11], %s2112_s4  ;;  %s3422_s16 = scalar_lea.vmem [#allocation12], %s2112_s4 }
 0x12a   : > { %2852 = dma.done.wait (%p3850_p4), %s720_s20, 2048  }
 0x12b   : > { %2854 = vsyncadd (%p3850_p4), %s720_s20, 4294965248  ;;  %s3851_s17 = sld [smem:[#allocation27_spill]]  ;;  %s3852_s13 = sld [smem:[#allocation26_spill]] }
 0x12c   : > { %s3857_s23 = sld [smem:[#allocation44_spill]]  ;;  %s3858_s14 = sld [smem:[#allocation50_spill]] }
 0x12d   : > { %s3859_s21 = sld [smem:[#allocation52_spill]]  ;;  %s3860_s15 = sld [smem:[#allocation53_spill]] }
 0x12e   : > { %s3861_s27 = sld [smem:[#allocation54_spill]]  ;;  %s3474_s12 = scalar_lea.vmem [#allocation14], %s2112_s4 }
 0x131   : > { %p829_p8 = scmp.lt.s32.totalorder %s3851_s17, 1  ;;  %p832_p11 = scmp.lt.s32.totalorder %s3852_s13, 1 }
 0x132   : > { %p2116_p6 = scmp.ne.s32.totalorder %s3852_s13, 0 }
 0x133   : > { %s3900_s17 = smov (!%p829_p8, %s3851_s17), 1  ;;  %v862_v0 = vld [vmem:[%s3402_s5] sm:$0xf] (!%p2116_p6)  ;;  %v2117_v14 = vld [vmem:[#allocation6] ss:$0 sm:$0xff] (!%p2116_p6) }
 0x134   : > { %s3434_s7 = scalar_select %p832_p11, %s3852_s13, 1 }
 0x135   : > { %861 = sbr.rel (%p2116_p6) target bundleno = 629 (0x275), region = 116  ;;  %v863_v1 = vunpack.c.l.bf16 (!%p2116_p6), %v862_v0  ;;  %v2118_v16 = vld [vmem:[#allocation8] ss:$0 sm:$0xff] (!%p2116_p6) }
 0x136   : > { %s2337_s11 = smul.u32 3, %s3434_s7  ;;  %s847_s0 = scalar_lea.vmem %s3858_s14, %s3434_s7 }
 0x137   : > { %s850_s30 = scalar_lea.vmem %s3859_s21, %s3434_s7  ;;  %s853_s20 = scalar_lea.vmem %s3860_s15, %s3434_s7  ;;  %866 = vadd.xlane.f32.xlu0 (!%p2116_p6), %v863_v1 }
 0x138   : > { %s3456_s22 = scalar_lea.vmem %s3857_s23, %s2337_s11  ;;  %s856_s10 = scalar_lea.vmem %s3861_s27, %s3434_s7 }
 0x139   : > { %s3862_s23 = sshll.u32 %s3396_s29, 2 }
 0x13a   : > { %s3478_s25 = scalar_lea.vmem [#allocation15], %s3862_s23 }
 0x1c4   : > { %v867_v2 = vpop.xlane.xlu0 %866 }
 0x1c5   : > { %v868_v3 = vmul.f32 0.015625, %v867_v2 }
 0x1c7   : > { %v869_v4 = vsub.f32 %v863_v1, %v868_v3  ;;  %v873_v6 = vmul.f32 64.0, %v868_v3 }
 0x1c9   : > { %v870_v5 = vmul.f32 %v869_v4, %v869_v4  ;;  %v874_v7 = vmul.f32 %v873_v6, %v868_v3 }
 0x1cb   : > { %871 = vadd.xlane.f32.xlu0 %v870_v5 }
 0x258   : > { %v872_v8 = vpop.xlane.xlu0 %871 }
 0x259   : > { %v875_v9 = vsub.f32 %v872_v8, %v874_v7 }
 0x25b   : > { %v876_v10 = vmul.f32 0.015625, %v875_v9 }
 0x25d   : > { %v877_v11 = vmax.f32 %v876_v10, 0.0 }
 0x25f   : > { %v878_v12 = vadd.f32 1e-12, %v877_v11 }
 0x261   : > { %2489 = vrsqrt.f32 %v878_v12 }
 0x26b   : > { %v2490_v13 = vpop.eup %2489 }
 0x26c   : > { %v880_v15 = vmul.f32 %v2490_v13, %v869_v4 }
 0x26e   : > { %v887_v17 = vmul.f32 %v2117_v14, %v880_v15 }
 0x270   : > { %v894_v18 = vadd.f32 %v2118_v16, %v887_v17 }
 0x272   : > { %v895_v19 = vpack.c.bf16 %v894_v18, %v894_v18 }
 0x274   : > { %896 = vst [vmem:[%s3478_s25] sm:$0xf] %v895_v19 }
 0x275 PF: > { %v2491_v20 = vld [vmem:[%s3414_s1 + $0x4] ss:$12 sps:$4 sm:$0xff]   ;;  %v2493_v21 = vld [vmem:[%s3414_s1] ss:$12 sps:$4 sm:$0xff]   ;;  %v2914_v22 = vmov 0   ;;  %v2915_v23 = vmov 0.0   ;;  %v933_v47 = vlaneseq }
 0x276   : > { %1108 = vmatprep.mubr.bf16.mxu0 %v2914_v22  ;;  %2230 = vmatprep.subr.bf16.mxu1 %v2915_v23  ;;  %v2494_v24 = vld [vmem:[%s3414_s1 + $0x1c] ss:$12 sps:$4 sm:$0xff]   ;;  %v2496_v25 = vld [vmem:[%s3414_s1 + $0x18] ss:$12 sps:$4 sm:$0xff]   ;;  %v2497_v26 = vld [vmem:[%s3414_s1 + $0x34] ss:$12 sps:$4 sm:$0xff]  }
 0x277   : > { %1076 = vmatprep.subr.bf16.mxu0 %v2491_v20  ;;  %v2499_v27 = vld [vmem:[%s3414_s1 + $0x30] ss:$12 sps:$4 sm:$0xff]   ;;  %v2500_v28 = vld [vmem:[%s3414_s1 + $0x4c] ss:$12 sps:$4 sm:$0xff]   ;;  %v2502_v29 = vld [vmem:[%s3414_s1 + $0x48] ss:$12 sps:$4 sm:$0xff]  }
 0x278   : > { %1077 = vmatpush1.bf16.msra.mxu0 %v2493_v21  ;;  %v2515_v30 = vld [vmem:[%s3414_s1 + $0x8] ss:$12 sps:$4 sm:$0xff]   ;;  %v2503_v31 = vld [vmem:[%s3414_s1 + $0x64] ss:$12 sps:$4 sm:$0xff]   ;;  %v2516_v32 = vld [vmem:[%s3414_s1 + $0x20] ss:$12 sps:$4 sm:$0xff]  }
 0x279   : > { %1078 = vmatprep.subr.bf16.mxu0 %v2494_v24  ;;  %2231 = vmatpush3.bf16.msra.mxu1 %v2515_v30  ;;  %v2505_v33 = vld [vmem:[%s3414_s1 + $0x60] ss:$12 sps:$4 sm:$0xff]   ;;  %v2506_v34 = vld [vmem:[%s3414_s1 + $0x7c] ss:$12 sps:$4 sm:$0xff]   ;;  %v2508_v35 = vld [vmem:[%s3414_s1 + $0x78] ss:$12 sps:$4 sm:$0xff]  }
 0x27a   : > { %2232 = vmatprep.subr.bf16.mxu1 %v2915_v23  ;;  %v2517_v36 = vld [vmem:[%s3414_s1 + $0x38] ss:$12 sps:$4 sm:$0xff]   ;;  %v2509_v37 = vld [vmem:[%s3414_s1 + $0x94] ss:$12 sps:$4 sm:$0xff]   ;;  %v2518_v38 = vld [vmem:[%s3414_s1 + $0x50] ss:$12 sps:$4 sm:$0xff]  }
 0x27b   : > { %v2511_v39 = vld [vmem:[%s3414_s1 + $0x90] ss:$12 sps:$4 sm:$0xff]   ;;  %v2512_v40 = vld [vmem:[%s3414_s1 + $0xac] ss:$12 sps:$4 sm:$0xff]   ;;  %v2519_v41 = vld [vmem:[%s3414_s1 + $0x68] ss:$12 sps:$4 sm:$0xff]  }
 0x27c   : > { %1079 = vmatpush1.bf16.msra.mxu0 %v2496_v25  ;;  %v2514_v42 = vld [vmem:[%s3414_s1 + $0xa8] ss:$12 sps:$4 sm:$0xff]   ;;  %v2520_v43 = vld [vmem:[%s3414_s1 + $0x80] ss:$12 sps:$4 sm:$0xff]   ;;  %v2521_v45 = vld [vmem:[%s3414_s1 + $0x98] ss:$12 sps:$4 sm:$0xff]  }
 0x27d   : > { %1080 = vmatprep.subr.bf16.mxu0 %v2497_v26  ;;  %2233 = vmatpush3.bf16.msra.mxu1 %v2516_v32  ;;  %v3511_v44 = vld [vmem:[%s3478_s25] sm:$0xf]  ;;  %v2522_v46 = vld [vmem:[%s3414_s1 + $0xb0] ss:$12 sps:$4 sm:$0xff]   ;;  %vm2916_vm0 = vmmov 0   ;;  %v934_v48 = vshrl.u32 %v933_v47, 7 }
 0x27e   : > { %2234 = vmatprep.subr.bf16.mxu1 %v2915_v23  ;;  %2246 = vmatprep.mubr.msk.bf16.mxu1 %vm2916_vm0, %v2915_v23  ;;  %v931_v50 = vld [vmem:[%s3456_s22] sm:$0x7]  ;;  %vm1166_vm1 = vcmask 523264   ;;  %s2917_s6 = smov 64   ;;  %vm1229_vm2 = vcmask 1043456   ;;  %s3863_s2 = sld [smem:[#allocation40_spill]] }
 0x27f   : > { %v939_v49 = vsub.s32 1, %v934_v48  ;;  %v935_v51 = vsub.s32 0, %v934_v48  ;;  %v943_v63 = vsub.s32 2, %v934_v48  ;;  %vm1213_vm3 = vcmask 64512   ;;  %s3865_s4 = sld [smem:[#allocation46_spill]]  ;;  %s3867_s13 = sld [smem:[#allocation47_spill]] }
 0x280   : > { %1081 = vmatpush1.bf16.msra.mxu0 %v2499_v27  ;;  %vm1391_vm4 = vcmask 1048064   ;;  %s3869_s9 = sld [smem:[#allocation48_spill]]  ;;  %s3873_s27 = sld [smem:[#allocation27_spill]] }
 0x281   : > { %1082 = vmatprep.subr.bf16.mxu0 %v2500_v28  ;;  %2235 = vmatpush3.bf16.msra.mxu1 %v2517_v36  ;;  %v940_v52 = vrot.slane %v931_v50, %v939_v49  ;;  %v936_v53 = vrot.slane %v931_v50, %v935_v51  ;;  %v944_v0 = vrot.slane %v931_v50, %v943_v63  ;;  %v2523_v50 = vld [vmem:[%s3420_s28] sm:$0xff]   ;;  %v2524_v51 = vld [vmem:[%s3420_s28 + $0x8] sm:$0xff]   ;;  %s1820_s1 = sshll.u32 %s3478_s25, 4  ;;  %s3654_s1 = int_to_ptr.vmem [resolvable:$true] %s1820_s1 }
 0x282   : > { %2236 = vmatprep.subr.bf16.mxu1 %v2915_v23 }
 0x284   : > { %1083 = vmatpush1.bf16.msra.mxu0 %v2502_v29  ;;  %s3864_s22 = scalar_lea.vmem %s3863_s2, %s3900_s17 }
 0x285   : > { %1084 = vmatprep.subr.bf16.mxu0 %v2503_v31  ;;  %2237 = vmatpush3.bf16.msra.mxu1 %v2518_v38  ;;  %v2143_v8 = vld [vmem:[%s3864_s22] ss:$0 sm:$0xff]  ;;  %s3868_s14 = scalar_lea.vmem %s3867_s13, %s3434_s7  ;;  %s2767_s13 = scalar_lea.vmem %s3654_s1, 64 }
 0x286   : > { %2238 = vmatprep.subr.bf16.mxu1 %v2915_v23  ;;  %s3870_s18 = scalar_lea.vmem %s3869_s9, %s3434_s7  ;;  %s2180_s5 = sshll.u32 %s3873_s27, 6 }
 0x287   : > { %p2768_p12 = scmp.ne.s32.totalorder %s3654_s1, %s2767_s13 }
 0x288   : > { %1085 = vmatpush1.bf16.msra.mxu0 %v2505_v33 }
 0x289   : > { %1086 = vmatprep.subr.bf16.mxu0 %v2506_v34  ;;  %2239 = vmatpush3.bf16.msra.mxu1 %v2519_v41 }
 0x28a   : > { %2240 = vmatprep.subr.bf16.mxu1 %v2915_v23 }
 0x28c   : > { %1087 = vmatpush1.bf16.msra.mxu0 %v2508_v35 }
 0x28d   : > { %1088 = vmatprep.subr.bf16.mxu0 %v2509_v37  ;;  %2241 = vmatpush3.bf16.msra.mxu1 %v2520_v43 }
 0x28e   : > { %2242 = vmatprep.subr.bf16.mxu1 %v2915_v23 }
 0x290   : > { %1089 = vmatpush1.bf16.msra.mxu0 %v2511_v39 }
 0x291   : > { %1090 = vmatprep.subr.bf16.mxu0 %v2512_v40  ;;  %2243 = vmatpush3.bf16.msra.mxu1 %v2521_v45 }
 0x292   : > { %2244 = vmatprep.subr.bf16.mxu1 %v2915_v23 }
 0x294   : > { %1091 = vmatpush1.bf16.msra.mxu0 %v2514_v42 }
 0x295   : > { %2274 = vmatprep.subr.bf16.mxu0 %v2915_v23  ;;  %2245 = vmatpush3.bf16.msra.mxu1 %v2522_v46 }
 0x296   : > { %2250 = vmatprep.subr.bf16.mxu1 %v2915_v23 }
 0x297   : > { %1109 = vmatmul.mubr.bf16.vlgmr.msra.gmra.mrb[0].mxu0 %v3511_v44 }
 0x298   : > { %2290 = vmatprep.mubr.msk.bf16.mxu0 %vm2916_vm0, %v2915_v23  ;;  %2247 = vmatmul.mubr.bf16.vlgmr.msra.gmra.mrb[0].mxu1 %v3511_v44 }
 0x299   : > { %2252 = vmatprep.mubr.msk.bf16.mxu1 %vm2916_vm0, %v2915_v23  ;;  %2275 = vmatpush3.bf16.msra.mxu0 %v2523_v50 }
 0x29a   : > { %2276 = vmatprep.subr.bf16.mxu0 %v2915_v23 }
 0x29d   : > { %2277 = vmatpush3.bf16.msra.mxu0 %v2524_v51 }
 0x29e   : > { %2278 = vmatprep.subr.bf16.mxu0 %v2915_v23 }
 0x36a   : > { %v1110_v54 = vpop.f32.mrb[0].mxu0 }
 0x36b   : > { %v1112_v55 = vpop.f32.mrb[1].mxu0  ;;  %v1111_v59 = vadd.f32 %v1110_v54, %v936_v53  ;;  %v1151_v1 = vpop.f32.mrb[0].mxu1  ;;  %v2526_v53 = vld [vmem:[%s3420_s28 + $0x18] sm:$0xff]   ;;  %v2527_v54 = vld [vmem:[%s3420_s28 + $0x20] sm:$0xff]  }
 0x36c   : > { %v1113_v56 = vadd.f32 %v1112_v55, %v940_v52  ;;  %v1114_v57 = vpop.f32.mrb[2].mxu0  ;;  %v1152_v2 = vadd.f32 %v1151_v1, %v944_v0  ;;  %v2248_v3 = vpop.f32.mrb[1].mxu1  ;;  %v2525_v52 = vld [vmem:[%s3420_s28 + $0x10] sm:$0xff]   ;;  %v2528_v55 = vld [vmem:[%s3420_s28 + $0x28] sm:$0xff]  }
 0x36d   : > { %v1115_v58 = vpop.f32.mrb[3].mxu0  ;;  %v1157_v62 = vpack.c.bf16 %v1111_v59, %v1111_v59  ;;  %v1154_v4 = vpop.f32.mrb[2].mxu1  ;;  %2279 = vmatpush3.bf16.msra.mxu0 %v2525_v52  ;;  %v2530_v57 = vld [vmem:[%s3420_s28 + $0x38] sm:$0xff]  }
 0x36e   : > { %v1158_v60 = vpack.c.bf16 %v1113_v56, %v1113_v56  ;;  %v1159_v5 = vpack.c.bf16 %v1152_v2, %v1152_v2  ;;  %v2249_v6 = vpop.f32.mrb[3].mxu1  ;;  %2280 = vmatprep.subr.bf16.mxu0 %v2915_v23  ;;  %v2529_v56 = vld [vmem:[%s3420_s28 + $0x30] sm:$0xff]   ;;  %s3866_s28 = scalar_lea.vmem %s3865_s4, %s3434_s7  ;;  %v1506_v2 = vunpack.c.l.bf16 %v3511_v44  ;;  %s2918_s7 = smov [#allocation15]  }
 0x36f   : > { %v2148_v1 = vld [vmem:[%s3866_s28] ss:$0 sm:$0xff] }
 0x370   : > { %v1171_v61 = vsel %vm1166_vm1, %v1158_v60, 0  ;;  %1278 = vrot.lane.b32.xlu1 %v1158_v60, %s2917_s6  ;;  %v1231_v7 = vsel %vm1229_vm2, %v1159_v5, 0 }
 0x371   : > { %2251 = vmatpush3.bf16.xpose.msra.mxu1 %v1171_v61  ;;  %2281 = vmatpush3.bf16.msra.mxu0 %v2526_v53 }
 0x372   : > { %2256 = vmatprep.subr.bf16.mxu1 %v2915_v23  ;;  %2282 = vmatprep.subr.bf16.mxu0 %v2915_v23 }
 0x374   : > { %1275 = vrot.lane.b32.xlu1 %v1157_v62, %s2917_s6 }
 0x375   : > { %2283 = vmatpush3.bf16.msra.mxu0 %v2527_v54 }
 0x376   : > { %2284 = vmatprep.subr.bf16.mxu0 %v2915_v23 }
 0x378   : > { %2253 = vmatmul.mubr.msk.bf16.vlgmr.msra.gmra.mrb[4].mxu1 %vm1166_vm1, %v1157_v62 }
 0x379   : > { %2258 = vmatprep.mubr.msk.bf16.mxu1 %vm2916_vm0, %v2915_v23  ;;  %2257 = vmatpush3.bf16.msra.mxu1 %v1231_v7 }
 0x37a   : > { %2262 = vmatprep.subr.bf16.mxu1 %v2915_v23  ;;  %2285 = vmatpush3.bf16.msra.mxu0 %v2528_v55 }
 0x37b   : > { %2286 = vmatprep.subr.bf16.mxu0 %v2915_v23 }
 0x37e   : > { %2287 = vmatpush3.bf16.msra.mxu0 %v2529_v56 }
 0x37f   : > { %2288 = vmatprep.subr.bf16.mxu0 %v2915_v23 }
 0x382   : > { %2289 = vmatpush3.bf16.msra.mxu0 %v2530_v57 }
 0x383   : > { %2314 = vmatprep.subr.bf16.mxu0 %v2915_v23 }
 0x3e2   : > { %v1279_v24 = vpop.permute.xlu1 %1278 }
 0x3e3   : > { %v1284_v26 = vsel %vm1166_vm1, %v1279_v24, 0 }
 0x3e6   : > { %v1276_v27 = vpop.permute.xlu1 %1275 }
 0x44b   : > { %v1207_v9 = vpop.f32.mrb[4].mxu1 }
 0x44c   : > { %v1208_v10 = vadd.f32 %v2143_v8, %v1207_v9  ;;  %v2254_v11 = vpop.f32.mrb[5].mxu1  ;;  %v2531_v9 = vld [vmem:[%s3422_s16] sm:$0xff]  }
 0x44d   : > { %v1210_v12 = vpop.f32.mrb[6].mxu1 }
 0x44e   : > { %v2255_v13 = vpop.f32.mrb[7].mxu1  ;;  %v1214_v14 = vsel %vm1213_vm3, %v1208_v10, -inf }
 0x44f   : > { %1215 = vmax.xlane.f32.xlu0 %v1214_v14  ;;  %v2532_v13 = vld [vmem:[%s3422_s16 + $0x8] sm:$0xff]   ;;  %v2533_v14 = vld [vmem:[%s3422_s16 + $0x10] sm:$0xff]  }
 0x4dc   : > { %v1216_v15 = vpop.xlane.xlu0 %1215 }
 0x4dd   : > { %v1217_v16 = vsub.f32 %v1208_v10, %v1216_v15  ;;  %v2534_v15 = vld [vmem:[%s3422_s16 + $0x18] sm:$0xff]  }
 0x4df   : > { %v1218_v17 = vmul.f32 1.442695, %v1217_v16  ;;  %v2535_v16 = vld [vmem:[%s3422_s16 + $0x20] sm:$0xff]  }
 0x4e1   : > { %2547 = vpow2.f32 %v1218_v17  ;;  %v2536_v17 = vld [vmem:[%s3422_s16 + $0x28] sm:$0xff]  }
 0x4eb   : > { %v2548_v18 = vpop.eup %2547 }
 0x4ec   : > { %v1220_v19 = vsel %vm1213_vm3, %v2548_v18, 0.0 }
 0x4ed   : > { %1221 = vadd.xlane.f32.xlu0 %v1220_v19  ;;  %v2538_v19 = vld [vmem:[%s3422_s16 + $0x38] sm:$0xff]  }
 0x57a   : > { %v1222_v20 = vpop.xlane.xlu0 %1221 }
 0x57b   : > { %2549 = vrcp.f32 %v1222_v20  ;;  %v2539_v20 = vld [vmem:[%s3474_s12] sm:$0xff]  }
 0x585   : > { %v2550_v21 = vpop.eup %2549 }
 0x586   : > { %v1224_v22 = vmul.f32 %v2550_v21, %v2548_v18  ;;  %v2537_v18 = vld [vmem:[%s3422_s16 + $0x30] sm:$0xff]   ;;  %s3877_s16 = sld [smem:[#allocation55_spill]] }
 0x588   : > { %v1225_v25 = vpack.c.bf16 %v1224_v22, %v1224_v22 }
 0x58a   : > { %2259 = vmatmul.mubr.msk.bf16.vlgmr.msra.gmra.mrb[8].mxu1 %vm1213_vm3, %v1225_v25 }
 0x58b   : > { %2263 = vmatpush3.bf16.xpose.msra.mxu1 %v1284_v26  ;;  %2264 = vmatprep.mubr.msk.bf16.mxu1 %vm2916_vm0, %v2915_v23 }
 0x58c   : > { %2268 = vmatprep.subr.bf16.mxu1 %v2915_v23  ;;  %s3652_s17 = scalar_lea.hbm %s3877_s16, %s2180_s5 }
 0x592   : > { %2265 = vmatmul.mubr.msk.bf16.vlgmr.msra.gmra.mrb[12].mxu1 %vm1166_vm1, %v1276_v27 }
 0x593   : > { %2270 = vmatprep.mubr.msk.bf16.mxu1 %vm2916_vm0, %v2915_v23 }
 0x65d   : > { %v1267_v28 = vpop.f32.mrb[8].mxu1 }
 0x65e   : > { %1273 = vst.msk [vmem:[#allocation2] sm:$0xff] %vm1166_vm1, %v1267_v28  ;;  %v2260_v29 = vpop.f32.mrb[9].mxu1 }
 0x65f   : > { %v1270_v30 = vpop.f32.mrb[10].mxu1 }
 0x660   : > { %v2261_v31 = vpop.f32.mrb[11].mxu1  ;;  %v2157_v30 = vld [vmem:[%s3868_s14] ss:$0 sm:$0xff] }
 0x665   : > { %v1320_v32 = vpop.f32.mrb[12].mxu1 }
 0x666   : > { %v1321_v33 = vadd.f32 %v2143_v8, %v1320_v32  ;;  %v2266_v34 = vpop.f32.mrb[13].mxu1  ;;  %v2158_v32 = vld [vmem:[%s3870_s18] ss:$0 sm:$0xff] }
 0x667   : > { %v1323_v35 = vpop.f32.mrb[14].mxu1 }
 0x668   : > { %v2267_v36 = vpop.f32.mrb[15].mxu1  ;;  %v1326_v37 = vsel %vm1213_vm3, %v1321_v33, -inf }
 0x669   : > { %1327 = vmax.xlane.f32.xlu0 %v1326_v37  ;;  %v2540_v36 = vld [vmem:[%s3474_s12 + $0x8] sm:$0xff]   ;;  %v2541_v37 = vld [vmem:[%s3474_s12 + $0x10] sm:$0xff]  }
 0x67f   : > { %1339 = vrot.lane.b32.xlu0 %v1159_v5, %s2917_s6 }
 0x6f6   : > { %v1328_v38 = vpop.xlane.xlu0 %1327 }
 0x6f7   : > { %v1329_v39 = vsub.f32 %v1321_v33, %v1328_v38  ;;  %v2542_v38 = vld [vmem:[%s3474_s12 + $0x18] sm:$0xff]  }
 0x6f9   : > { %v1330_v40 = vmul.f32 1.442695, %v1329_v39  ;;  %v2543_v39 = vld [vmem:[%s3474_s12 + $0x20] sm:$0xff]  }
 0x6fa   : > { %v1340_v41 = vpop.permute.xlu0 %1339 }
 0x6fb   : > { %2551 = vpow2.f32 %v1330_v40  ;;  %v1345_v42 = vsel %vm1229_vm2, %v1340_v41, 0  ;;  %v2544_v40 = vld [vmem:[%s3474_s12 + $0x28] sm:$0xff]   ;;  %v2545_v41 = vld [vmem:[%s3474_s12 + $0x30] sm:$0xff]  }
 0x6fc   : > { %2269 = vmatpush3.bf16.msra.mxu1 %v1345_v42  ;;  %v2546_v42 = vld [vmem:[%s3474_s12 + $0x38] sm:$0xff]  }
 0x6fd   : > { %2294 = vmatprep.subr.bf16.mxu1 %v2915_v23 }
 0x705   : > { %v2552_v43 = vpop.eup %2551 }
 0x706   : > { %v1332_v45 = vsel %vm1213_vm3, %v2552_v43, 0.0 }
 0x707   : > { %1333 = vadd.xlane.f32.xlu1 %v1332_v45 }
 0x794   : > { %v1334_v46 = vpop.xlane.xlu1 %1333 }
 0x795   : > { %2553 = vrcp.f32 %v1334_v46 }
 0x79f   : > { %v2554_v47 = vpop.eup %2553 }
 0x7a0   : > { %v1336_v48 = vmul.f32 %v2554_v47, %v2552_v43  ;;  %v2159_v43 = vld [vmem:[%s847_s0] ss:$0 sm:$0xff] }
 0x7a2   : > { %v1337_v49 = vpack.c.bf16 %v1336_v48, %v1336_v48 }
 0x7a4   : > { %2271 = vmatmul.mubr.msk.bf16.vlgmr.msra.gmra.mrb[16].mxu1 %vm1213_vm3, %v1337_v49 }
 0x7a5   : > { %2310 = vmatprep.mubr.msk.bf16.mxu1 %vm2916_vm0, %v2915_v23  ;;  %2295 = vmatpush3.bf16.msra.mxu1 %v2531_v9 }
 0x7a6   : > { %2296 = vmatprep.subr.bf16.mxu1 %v2915_v23 }
 0x7a9   : > { %2297 = vmatpush3.bf16.msra.mxu1 %v2532_v13  ;;  %v2177_v13 = vld [vmem:[%s853_s20] ss:$0 sm:$0xff]  ;;  %s1807_s20 = scalar_lea.sflag [#allocation5], %s3396_s29 }
 0x7aa   : > { %2298 = vmatprep.subr.bf16.mxu1 %v2915_v23 }
 0x7ad   : > { %2299 = vmatpush3.bf16.msra.mxu1 %v2533_v14 }
 0x7ae   : > { %2300 = vmatprep.subr.bf16.mxu1 %v2915_v23 }
 0x7b1   : > { %2301 = vmatpush3.bf16.msra.mxu1 %v2534_v15  ;;  %v2178_v15 = vld [vmem:[%s856_s10] ss:$0 sm:$0xff]  ;;  %s2771_s10 = sshll.u32 %s2918_s7, 4  ;;  %s2772_s10 = int_to_ptr.vmem [resolvable:$false] %s2771_s10 }
 0x7b2   : > { %2302 = vmatprep.subr.bf16.mxu1 %v2915_v23  ;;  %s2773_s14 = scalar_lea.vmem %s2772_s10, 128  ;;  %p2774_p10 = scmp.lt.s32.totalorder %s3654_s1, %s2772_s10 }
 0x7b3   : > { %p2775_p1 = scmp.lt.s32.totalorder %s2773_s14, %s2767_s13 }
 0x7b5   : > { %2303 = vmatpush3.bf16.msra.mxu1 %v2535_v16  ;;  %p2776_p2 = por %p2775_p1, %p2774_p10 }
 0x7b6   : > { %2304 = vmatprep.subr.bf16.mxu1 %v2915_v23 }
 0x7b9   : > { %2305 = vmatpush3.bf16.msra.mxu1 %v2536_v17 }
 0x7ba   : > { %2306 = vmatprep.subr.bf16.mxu1 %v2915_v23 }
 0x7bd   : > { %2307 = vmatpush3.bf16.msra.mxu1 %v2537_v18 }
 0x7be   : > { %2308 = vmatprep.subr.bf16.mxu1 %v2915_v23 }
 0x7c1   : > { %2309 = vmatpush3.bf16.msra.mxu1 %v2538_v19 }
 0x877   : > { %v1381_v58 = vpop.f32.mrb[16].mxu1 }
 0x878   : > { %1388 = vrot.lane.b32.xlu0 %v1381_v58, %s2917_s6  ;;  %v2272_v59 = vpop.f32.mrb[17].mxu1 }
 0x879   : > { %v1384_v60 = vpop.f32.mrb[18].mxu1  ;;  %v2168_v59 = vld [vmem:[%s850_s30] ss:$0 sm:$0xff]  ;;  %s3874_s30 = sld [smem:[#allocation36_spill]] }
 0x87a   : > { %v2273_v61 = vpop.f32.mrb[19].mxu1 }
 0x87f   : > { %p3878_p0 = scmp.ne.s32.totalorder %s3874_s30, 0 }
 0x881   : > { %p2769_p7 = pnand %p2768_p12, %p3878_p0 }
 0x883   : > { %p2770_p9 = pneg %p2769_p7 }
 0x885   : > { %p2777_p3 = pnand %p2776_p2, %p2770_p9 }
 0x8ea   : > { %v1389_v62 = vpop.permute.xlu0 %1388 }
 0x8eb   : > { %1392 = vst.msk [vmem:[#allocation2] sm:$0xff] %vm1391_vm4, %v1389_v62 }
 0x8f2   : > { %v1393_v63 = vld [vmem:[#allocation2] sm:$0xff] }
 0x8f3   : > { %v1394_v0 = vpack.c.bf16 %v1393_v63, %v1393_v63 }
 0x8f5   : > { %2291 = vmatmul.mubr.bf16.vlgmr.msra.gmra.mrb[4].mxu0 %v1394_v0 }
 0x8f6   : > { %2330 = vmatprep.mubr.msk.bf16.mxu0 %vm2916_vm0, %v2915_v23  ;;  %2315 = vmatpush3.bf16.msra.mxu0 %v2539_v20 }
 0x8f7   : > { %2316 = vmatprep.subr.bf16.mxu0 %v2915_v23 }
 0x8fa   : > { %2317 = vmatpush3.bf16.msra.mxu0 %v2540_v36 }
 0x8fb   : > { %2318 = vmatprep.subr.bf16.mxu0 %v2915_v23 }
 0x8fe   : > { %2319 = vmatpush3.bf16.msra.mxu0 %v2541_v37 }
 0x8ff   : > { %2320 = vmatprep.subr.bf16.mxu0 %v2915_v23 }
 0x902   : > { %2321 = vmatpush3.bf16.msra.mxu0 %v2542_v38 }
 0x903   : > { %2322 = vmatprep.subr.bf16.mxu0 %v2915_v23 }
 0x906   : > { %2323 = vmatpush3.bf16.msra.mxu0 %v2543_v39 }
 0x907   : > { %2324 = vmatprep.subr.bf16.mxu0 %v2915_v23 }
 0x90a   : > { %2325 = vmatpush3.bf16.msra.mxu0 %v2544_v40 }
 0x90b   : > { %2326 = vmatprep.subr.bf16.mxu0 %v2915_v23 }
 0x90e   : > { %2327 = vmatpush3.bf16.msra.mxu0 %v2545_v41 }
 0x90f   : > { %2328 = vmatprep.subr.bf16.mxu0 %v2915_v23 }
 0x912   : > { %2329 = vmatpush3.bf16.msra.mxu0 %v2546_v42 }
 0x9c8   : > { %v1500_v3 = vpop.f32.mrb[4].mxu0 }
 0x9c9   : > { %v1501_v4 = vadd.f32 %v2148_v1, %v1500_v3  ;;  %v2292_v5 = vpop.f32.mrb[5].mxu0 }
 0x9ca   : > { %v1503_v6 = vpop.f32.mrb[6].mxu0 }
 0x9cb   : > { %v2293_v7 = vpop.f32.mrb[7].mxu0  ;;  %v1507_v8 = vadd.f32 %v1506_v2, %v1501_v4 }
 0x9cd   : > { %1510 = vadd.xlane.f32.xlu0 %v1507_v8 }
 0xa5a   : > { %v1511_v10 = vpop.xlane.xlu0 %1510 }
 0xa5b   : > { %v1512_v11 = vmul.f32 0.015625, %v1511_v10 }
 0xa5d   : > { %v1513_v12 = vsub.f32 %v1507_v8, %v1512_v11  ;;  %v1517_v21 = vmul.f32 64.0, %v1512_v11 }
 0xa5f   : > { %v1514_v44 = vmul.f32 %v1513_v12, %v1513_v12  ;;  %v1518_v22 = vmul.f32 %v1517_v21, %v1512_v11 }
 0xa61   : > { %1515 = vadd.xlane.f32.xlu1 %v1514_v44 }
 0xaee   : > { %v1516_v24 = vpop.xlane.xlu1 %1515 }
 0xaef   : > { %v1519_v25 = vsub.f32 %v1516_v24, %v1518_v22 }
 0xaf1   : > { %v1520_v26 = vmul.f32 0.015625, %v1519_v25 }
 0xaf3   : > { %v1521_v27 = vmax.f32 %v1520_v26, 0.0 }
 0xaf5   : > { %v1522_v28 = vadd.f32 1e-12, %v1521_v27 }
 0xaf7   : > { %2555 = vrsqrt.f32 %v1522_v28 }
 0xb01   : > { %v2556_v29 = vpop.eup %2555 }
 0xb02   : > { %v1524_v31 = vmul.f32 %v2556_v29, %v1513_v12 }
 0xb04   : > { %v1531_v33 = vmul.f32 %v2157_v30, %v1524_v31 }
 0xb06   : > { %v1538_v34 = vadd.f32 %v2158_v32, %v1531_v33 }
 0xb08   : > { %v1539_v35 = vpack.c.bf16 %v1538_v34, %v1538_v34 }
 0xb0a   : > { %2311 = vmatmul.mubr.bf16.vlgmr.msra.gmra.mrb[20].mxu1 %v1539_v35 }
 0xbdd   : > { %v1645_v45 = vpop.f32.mrb[20].mxu1 }
 0xbde   : > { %v1646_v46 = vadd.f32 %v2159_v43, %v1645_v45  ;;  %v2312_v47 = vpop.f32.mrb[21].mxu1 }
 0xbdf   : > { %v1648_v48 = vpop.f32.mrb[22].mxu1 }
 0xbe0   : > { %v1652_v49 = vmul.f32 0.044715, %v1646_v46  ;;  %v2313_v50 = vpop.f32.mrb[23].mxu1  ;;  %v1651_v23 = vmul.f32 0.5, %v1646_v46 }
 0xbe2   : > { %v1653_v51 = vmul.f32 %v1652_v49, %v1646_v46 }
 0xbe4   : > { %v1654_v52 = vmul.f32 %v1653_v51, %v1646_v46 }
 0xbe6   : > { %v1655_v53 = vadd.f32 %v1654_v52, %v1646_v46 }
 0xbe8   : > { %v1656_v54 = vmul.f32 0.7978846, %v1655_v53 }
 0xbea   : > { %2557 = vtanh.f32 %v1656_v54 }
 0xbf4   : > { %v2558_v55 = vpop.eup %2557 }
 0xbf5   : > { %v1658_v56 = vadd.f32 1.0, %v2558_v55 }
 0xbf7   : > { %v1659_v57 = vmul.f32 %v1658_v56, %v1651_v23 }
 0xbf9   : > { %v1660_v58 = vpack.c.bf16 %v1659_v57, %v1659_v57 }
 0xbfb   : > { %2331 = vmatmul.mubr.bf16.vlgmr.msra.gmra.mrb[8].mxu0 %v1660_v58 }
 0xcce   : > { %v1766_v60 = vpop.f32.mrb[8].mxu0 }
 0xccf   : > { %v1767_v61 = vadd.f32 %v2168_v59, %v1766_v60  ;;  %v2332_v62 = vpop.f32.mrb[9].mxu0 }
 0xcd0   : > { %v1769_v63 = vpop.f32.mrb[10].mxu0 }
 0xcd1   : > { %v2333_v0 = vpop.f32.mrb[11].mxu0  ;;  %v1772_v1 = vadd.f32 %v1767_v61, %v1538_v34 }
 0xcd3   : > { %1775 = vadd.xlane.f32.xlu1 %v1772_v1 }
 0xd60   : > { %v1776_v2 = vpop.xlane.xlu1 %1775 }
 0xd61   : > { %v1777_v3 = vmul.f32 0.015625, %v1776_v2 }
 0xd63   : > { %v1778_v4 = vsub.f32 %v1772_v1, %v1777_v3  ;;  %v1782_v6 = vmul.f32 64.0, %v1777_v3 }
 0xd65   : > { %v1779_v5 = vmul.f32 %v1778_v4, %v1778_v4  ;;  %v1783_v7 = vmul.f32 %v1782_v6, %v1777_v3 }
 0xd67   : > { %1780 = vadd.xlane.f32.xlu1 %v1779_v5 }
 0xdf4   : > { %v1781_v8 = vpop.xlane.xlu1 %1780 }
 0xdf5   : > { %v1784_v9 = vsub.f32 %v1781_v8, %v1783_v7 }
 0xdf7   : > { %v1785_v10 = vmul.f32 0.015625, %v1784_v9 }
 0xdf9   : > { %v1786_v11 = vmax.f32 %v1785_v10, 0.0 }
 0xdfb   : > { %v1787_v12 = vadd.f32 1e-12, %v1786_v11 }
 0xdfd   : > { %2559 = vrsqrt.f32 %v1787_v12 }
 0xe07   : > { %v2560_v44 = vpop.eup %2559 }
 0xe08   : > { %v1789_v14 = vmul.f32 %v2560_v44, %v1778_v4 }
 0xe0a   : > { %v1796_v16 = vmul.f32 %v2177_v13, %v1789_v14 }
 0xe0c   : > { %v1803_v17 = vadd.f32 %v2178_v15, %v1796_v16 }
 0xe0e   : > { %v1804_v18 = vpack.c.bf16 %v1803_v17, %v1803_v17 }
 0xe10   : > { %1805 = vst [vmem:[%s3478_s25] sm:$0xf] %v1804_v18 }
 0xe11   : > { %2780 = shalt.err (!%p2777_p3)
}
 0xe12   : > { %s2781_s29 = scalar_lea.hbm %s3652_s17, 64  ;;  %s2785_s19 = scalar_lea.hbm %s3877_s16, 128 }
 0xe13   : > { %p2782_p13 = scmp.ne.s32.totalorder %s3652_s17, %s2781_s29  ;;  %p2786_p8 = scmp.lt.u32.totalorder %s3652_s17, %s3877_s16 }
 0xe14   : > { %p2787_p11 = scmp.lt.u32.totalorder %s2785_s19, %s2781_s29  ;;  %p2789_p12 = scmp.lt.u32.totalorder %s2781_s29, %s3652_s17 }
 0xe15   : > { %p2783_p5 = pnand %p2782_p13, %p3878_p0 }
 0xe16   : > { %p2788_p6 = por %p2787_p11, %p2786_p8 }
 0xe17   : > { %p2784_p4 = pneg %p2783_p5 }
 0xe18   : > { %p2790_p7 = por %p2789_p12, %p2788_p6 }
 0xe1a   : > { %p2791_p9 = pnand %p2790_p7, %p2784_p4 }
 0xe1c   : > { %2794 = shalt.err (!%p2791_p9)
}
 0xe1d   : > { %2356 = dma.vmem_to_hbm [thread:$0]  (%p3878_p0), %s3654_s1, 64, %s3652_s17, %s1807_s20  }
 0xe1e PF: > { %s3879_s21 = sld [smem:[#allocation30_spill]]  ;;  %s3880_s3 = sld [smem:[#allocation23_spill]] }
 0xe1f   : > { %s3881_s15 = sld [smem:[#allocation38_spill]] }
 0xe24   : > { %p2390_p10 = scmp.ge.s32.totalorder %s3879_s21, 2  ;;  %s1832_s12 = sand.u32 1, %s3880_s3  }
 0xe25   : > { %p3882_p1 = scmp.ne.s32.totalorder %s3881_s15, 0  ;;  %s1833_s0 = scalar_lea.sflag [#allocation5], %s1832_s12 }
 0xe27   : > { %p2382_p2 = pnand %p2390_p10, %p3882_p1 }
 0xe29   : > { %2856 = dma.done.wait (!%p2382_p2), %s1833_s0, 64  }
 0xe2a   : > { %2858 = vsyncadd (!%p2382_p2), %s1833_s0, 4294967232  ;;  %s39_s0 = sadd.s32 1, %s3879_s21   ;;  %s3883_s21 = sld [smem:[#allocation21_spill]] }
 0xe2b   : > { %p36_p3 = scmp.ge.s32.totalorder %s39_s0, 6   ;;  %s3884_s22 = sld [smem:[#allocation22_spill]] }
 0xe2c   : > { %s3885_s23 = sld [smem:[#allocation35_spill]]  ;;  %s3886_s24 = sld [smem:[#allocation24_spill]] }
 0xe2d   : > { %s3887_s25 = sld [smem:[#allocation25_spill]]  ;;  %s3888_s26 = sld [smem:[#allocation37_spill]] }
 0xe2e   : > { %s3889_s27 = sld [smem:[#allocation28_spill]]  ;;  %s3890_s28 = sld [smem:[#allocation29_spill]] }
 0xe2f   : > { %s3891_s29 = sld [smem:[#allocation33_spill]]  ;;  %s3892_s30 = sld [smem:[#allocation34_spill]] }
 0xe30   :  { %38 = sbr.rel (!%p36_p3) target bundleno = 32 (0x20), region = 216 }
 0xe37   :  { %1838 = vsyncpa [#allocation4], 1 }
 0xe38   :  { %1840 = vsyncpa [#allocation4 + $0x1], 1 }
 0xe39   :  { %1841 = vsyncpa [#allocation7], 1 }
 0xe3a   :  { %1842 = vsyncpa [#allocation10], 1 }
 0xe3b   :  { %1844 = vsyncpa [#allocation10 + $0x1], 1 }
 0xe3c   :  { %1845 = vsyncpa [#allocation13], 1 }
 0xe3d   :  { %1847 = vsyncpa [#allocation13 + $0x1], 1 }
 0xe3e   :  { %1848 = vsyncpa [#allocation5], 1 }
 0xe3f   :  { %1850 = vsyncpa [#allocation5 + $0x1], 1 }

</bundles_post_ra>
